<compile_context>
chip_gen: v6e
topology: v6e:2x2x1
jax: 0.10.0
libtpu: 0.0.40
codegen_flags: <defaults>
</compile_context>

<pallas_src>
import jax
import jax.numpy as jnp
from jax import lax
from jax.experimental import pallas as pl
from jax.experimental.pallas import tpu as pltpu

EPS = 1e-5


def resblk_kernel(x_ref, w1_ref, g1_ref, b1_ref,
                  w2_ref, g2_ref, b2_ref,
                  w3_ref, g3_ref, b3_ref,
                  fold_ref, unfold_ref,
                  out_ref, xpad_ref, h1pad_ref):
    N, Hp, WCin = xpad_ref.shape
    H = Hp - 2
    WCout = out_ref.shape[-1]
    M = N * H
    Cout = g1_ref.shape[-1]
    Wd = WCout // Cout
    inv_n = 1.0 / float(M * Wd)

    def bn(h, g_ref, b_ref, relu):
        # h: (M, W*Cout) f32.  Per-channel stats over N, H (rows) and W (folded
        # into the lane dim via a tiny one-hot MXU matmul).  Two-pass variance.
        col_sum = jnp.sum(h, axis=0, keepdims=True)                       # (1, W*Cout)
        mean_c = jnp.dot(col_sum, fold_ref[...],
                         preferred_element_type=jnp.float32) * inv_n      # (1, Cout)
        mean_row = jnp.dot(mean_c, unfold_ref[...],
                           preferred_element_type=jnp.float32)            # (1, W*Cout)
        cen = h - mean_row
        col_sq = jnp.sum(cen * cen, axis=0, keepdims=True)
        var_c = jnp.dot(col_sq, fold_ref[...],
                        preferred_element_type=jnp.float32) * inv_n       # (1, Cout)
        scale_c = g_ref[...] * lax.rsqrt(var_c + EPS)                     # (1, Cout)
        scale_row = jnp.dot(scale_c, unfold_ref[...],
                            preferred_element_type=jnp.float32)
        beta_row = jnp.dot(b_ref[...], unfold_ref[...],
                           preferred_element_type=jnp.float32)
        y = cen * scale_row + beta_row
        return jnp.maximum(y, 0.0) if relu else y

    def conv_rows(padded_ref, center, w_ref, width):
        # 3x3 conv as 3 lane-dense bf16 MXU matmuls (one per kh tap):
        # (M, width) @ (width, W*Cout), f32 accumulation.  kw taps and the
        # W-direction zero padding are already folded into the banded weight.
        acc = jnp.dot(center.astype(jnp.bfloat16), w_ref[1],
                      preferred_element_type=jnp.float32)
        for kh in (0, 2):
            xk = padded_ref[:, kh:kh + H, :].reshape(M, width)
            acc = acc + jnp.dot(xk.astype(jnp.bfloat16), w_ref[kh],
                                preferred_element_type=jnp.float32)
        return acc

    # ---- stage x with a 1-row H halo in VMEM (zero only the border rows) ----
    x3 = x_ref[...]                                              # (N, H, W*Cin) f32
    xpad_ref[:, 0:1, :] = jnp.zeros((N, 1, WCin), jnp.float32)
    xpad_ref[:, H + 1:H + 2, :] = jnp.zeros((N, 1, WCin), jnp.float32)
    xpad_ref[:, 1:H + 1, :] = x3
    x_center = x3.reshape(M, WCin)

    # ---- conv1 (3x3) -> bn1 -> relu -----------------------------------------
    h1 = bn(conv_rows(xpad_ref, x_center, w1_ref, WCin), g1_ref, b1_ref, relu=True)

    # ---- stage h1 with a 1-row H halo (lane-dense scratch, border-only zero) -
    h1pad_ref[:, 0:1, :] = jnp.zeros((N, 1, WCout), jnp.float32)
    h1pad_ref[:, H + 1:H + 2, :] = jnp.zeros((N, 1, WCout), jnp.float32)
    h1pad_ref[:, 1:H + 1, :] = h1.reshape(N, H, WCout)

    # ---- conv2 (3x3) -> bn2 (no relu yet) ------------------------------------
    h2 = bn(conv_rows(h1pad_ref, h1, w2_ref, WCout), g2_ref, b2_ref, relu=False)

    # ---- downsample branch: 1x1 conv -> bn3 ----------------------------------
    idn = jnp.dot(x_center.astype(jnp.bfloat16), w3_ref[...],
                  preferred_element_type=jnp.float32)            # (M, W*Cout)
    idn = bn(idn, g3_ref, b3_ref, relu=False)

    # ---- residual add + relu; fully lane-dense (M, 128) store ---------------
    out_ref[...] = jnp.maximum(h2 + idn, 0.0)


# ----------------------- wrapper-side weight repacking ------------------------
def _band_3x3(w9, Wd):
    """(9, Cin, Cout) -> (3, W*Cin, W*Cout) block-Toeplitz over W (kh-indexed)."""
    cin, cout = w9.shape[1], w9.shape[2]
    w = w9.reshape(3, 3, cin, cout)
    wi = jnp.arange(Wd)[:, None]
    wo = jnp.arange(Wd)[None, :]
    sel = jnp.stack([(wi == wo + k - 1) for k in range(3)], axis=0).astype(w9.dtype)
    band = jnp.einsum("kxy,hkio->hxiyo", sel, w)          # (3, W, Cin, W, Cout)
    return band.reshape(3, Wd * cin, Wd * cout)


def _band_1x1(w3, Wd):
    """(Cin, Cout) -> (W*Cin, W*Cout) block-diagonal."""
    cin, cout = w3.shape
    eye = jnp.eye(Wd, dtype=w3.dtype)
    return jnp.einsum("xy,io->xiyo", eye, w3).reshape(Wd * cin, Wd * cout)


@jax.jit
def resblk_forward(x_nchw, params):
    """x_nchw: (N, Cin, H, W) f32 -> (N, Cout, H, W) f32."""
    N, Cin, H, W = x_nchw.shape
    Cout = params["w1"].shape[-1]
    WCin, WCout = W * Cin, W * Cout
    M = N * H

    # NCHW -> lane-dense (N, H, W*Cin) rows; no padded copy in HBM.
    x3 = jnp.transpose(x_nchw, (0, 2, 3, 1)).reshape(N, H, WCin)

    # banded weights (bf16 for the MXU), channel fold/expand one-hots (f32).
    w1b = _band_3x3(params["w1"], W).astype(jnp.bfloat16)     # (3, W*Cin,  W*Cout)
    w2b = _band_3x3(params["w2"], W).astype(jnp.bfloat16)     # (3, W*Cout, W*Cout)
    w3b = _band_1x1(params["w3"], W).astype(jnp.bfloat16)     # (W*Cin, W*Cout)
    unfold = jnp.tile(jnp.eye(Cout, dtype=jnp.float32), (1, W))   # (Cout, W*Cout)
    fold = unfold.T                                               # (W*Cout, Cout)

    flops = 2 * M * WCout * (3 * WCin + 3 * WCout + WCin) + 20 * M * WCout
    bytes_accessed = (x3.size * 4 + (w1b.size + w2b.size + w3b.size) * 2
                      + M * WCout * 4)

    vmem = pl.BlockSpec(memory_space=pltpu.MemorySpace.VMEM)
    out2d = pl.pallas_call(
        resblk_kernel,
        out_shape=jax.ShapeDtypeStruct((M, WCout), jnp.float32),
        in_specs=[vmem] * 12,
        out_specs=vmem,
        scratch_shapes=[pltpu.VMEM((N, H + 2, WCin), jnp.float32),
                        pltpu.VMEM((N, H + 2, WCout), jnp.float32)],
        compiler_params=pltpu.CompilerParams(vmem_limit_bytes=32 * 1024 * 1024),
        cost_estimate=pl.CostEstimate(flops=int(flops),
                                      transcendentals=3 * int(Cout),
                                      bytes_accessed=int(bytes_accessed)),
    )(x3,
      w1b, params["g1"], params["b1"],
      w2b, params["g2"], params["b2"],
      w3b, params["g3"], params["b3"],
      fold, unfold)

    out = out2d.reshape(N, H, W, Cout)
    return jnp.transpose(out, (0, 3, 1, 2))                  # NHWC -> NCHW


# ----------------------------- pure-JAX reference -----------------------------
# Mirrors the kernel's MXU precision policy (bf16 matmul operands, f32
# accumulation, f32 BatchNorm) so the check isolates the Pallas plumbing.
def resblk_reference(x_nchw, params):
    x = jnp.transpose(x_nchw, (0, 2, 3, 1))

    def conv3x3(inp, w9):
        w4 = w9.reshape(3, 3, w9.shape[1], w9.shape[2]).astype(jnp.bfloat16)
        return lax.conv_general_dilated(
            inp.astype(jnp.bfloat16), w4, window_strides=(1, 1), padding="SAME",
            dimension_numbers=("NHWC", "HWIO", "NHWC"),
            preferred_element_type=jnp.float32)

    def bn(t, g, b):
        mean = jnp.mean(t, axis=(0, 1, 2), keepdims=True)
        var = jnp.var(t, axis=(0, 1, 2), keepdims=True)   # biased, PyTorch train BN
        return (t - mean) * lax.rsqrt(var + EPS) * g.reshape(1, 1, 1, -1) \
               + b.reshape(1, 1, 1, -1)

    out = jax.nn.relu(bn(conv3x3(x, params["w1"]), params["g1"], params["b1"]))
    out = bn(conv3x3(out, params["w2"]), params["g2"], params["b2"])
    idn = jnp.einsum("nhwc,cd->nhwd", x.astype(jnp.bfloat16),
                     params["w3"].astype(jnp.bfloat16),
                     preferred_element_type=jnp.float32)
    idn = bn(idn, params["g3"], params["b3"])
    return jnp.transpose(jax.nn.relu(out + idn), (0, 3, 1, 2))


# ---------------------------------- main --------------------------------------
if __name__ == "__main__":
    N, Cin, Cout, H, W = 2, 4, 8, 16, 16   # inplanes != planes -> downsample path

    key = jax.random.PRNGKey(0)
    kx, k1, k2, k3, kg1, kb1, kg2, kb2, kg3, kb3 = jax.random.split(key, 10)

    x = jax.random.normal(kx, (N, Cin, H, W), jnp.float32)

    params = {
        # conv1: 3x3, Cin -> Cout   (stored as (9, Cin, Cout), index = kh*3+kw)
        "w1": jax.random.normal(k1, (9, Cin, Cout), jnp.float32) * 0.2,
        "g1": jax.random.uniform(kg1, (1, Cout), jnp.float32, 0.5, 1.5),
        "b1": jax.random.normal(kb1, (1, Cout), jnp.float32) * 0.1,
        # conv2: 3x3, Cout -> Cout
        "w2": jax.random.normal(k2, (9, Cout, Cout), jnp.float32) * 0.2,
        "g2": jax.random.uniform(kg2, (1, Cout), jnp.float32, 0.5, 1.5),
        "b2": jax.random.normal(kb2, (1, Cout), jnp.float32) * 0.1,
        # conv3 (downsample 1x1): Cin -> Cout
        "w3": jax.random.normal(k3, (Cin, Cout), jnp.float32) * 0.2,
        "g3": jax.random.uniform(kg3, (1, Cout), jnp.float32, 0.5, 1.5),
        "b3": jax.random.normal(kb3, (1, Cout), jnp.float32) * 0.1,
    }

    out = resblk_forward(x, params)
    out = jax.block_until_ready(out)

    ref = resblk_reference(x, params)
    assert out.shape == (N, Cout, H, W)
    max_err = float(jnp.max(jnp.abs(out - ref)))
    assert jnp.allclose(out, ref, atol=1e-2, rtol=1e-2), max_err

    print("KERNEL_OK")
</pallas_src>

<mosaic_0001>
module attributes {stable_mosaic.version = 11 : i64} {
  func.func @resblk_kernel(%arg0: memref<2x16x64xf32, #tpu.memory_space<vmem>>, %arg1: memref<3x64x128xbf16, #tpu.memory_space<vmem>>, %arg2: memref<1x8xf32, #tpu.memory_space<vmem>>, %arg3: memref<1x8xf32, #tpu.memory_space<vmem>>, %arg4: memref<3x128x128xbf16, #tpu.memory_space<vmem>>, %arg5: memref<1x8xf32, #tpu.memory_space<vmem>>, %arg6: memref<1x8xf32, #tpu.memory_space<vmem>>, %arg7: memref<64x128xbf16, #tpu.memory_space<vmem>>, %arg8: memref<1x8xf32, #tpu.memory_space<vmem>>, %arg9: memref<1x8xf32, #tpu.memory_space<vmem>>, %arg10: memref<128x8xf32, #tpu.memory_space<vmem>>, %arg11: memref<8x128xf32, #tpu.memory_space<vmem>>, %arg12: memref<32x128xf32, #tpu.memory_space<vmem>>, %arg13: memref<2x18x64xf32, #tpu.memory_space<vmem>>, %arg14: memref<2x18x128xf32, #tpu.memory_space<vmem>>) attributes {dimension_semantics = [], scalar_prefetch = 0 : i64, scratch_operands = 2 : i64, tpu.core_type = #tpu.core_type<tc>} {
    %c0 = arith.constant 0 : index
    %c0_0 = arith.constant 0 : index
    %c0_1 = arith.constant 0 : index
    %0 = vector.load %arg0[%c0, %c0_0, %c0_1] : memref<2x16x64xf32, #tpu.memory_space<vmem>>, vector<2x16x64xf32>
    %cst = arith.constant 0.000000e+00 : f32
    %1 = vector.broadcast %cst : f32 to vector<2x1x64xf32>
    %c0_2 = arith.constant 0 : index
    %c0_3 = arith.constant 0 : index
    %c0_4 = arith.constant 0 : index
    %2 = vector.load %arg13[%c0_2, %c0_3, %c0_4] : memref<2x18x64xf32, #tpu.memory_space<vmem>>, vector<2x1x64xf32>
    tpu.vector_store %arg13[%c0_2, %c0_3, %c0_4], %1 {strides = array<i32>} : memref<2x18x64xf32, #tpu.memory_space<vmem>>, vector<2x1x64xf32>,
    %cst_5 = arith.constant 0.000000e+00 : f32
    %3 = vector.broadcast %cst_5 : f32 to vector<2x1x64xf32>
    %c0_6 = arith.constant 0 : index
    %c17 = arith.constant 17 : index
    %c0_7 = arith.constant 0 : index
    %4 = vector.load %arg13[%c0_6, %c17, %c0_7] : memref<2x18x64xf32, #tpu.memory_space<vmem>>, vector<2x1x64xf32>
    tpu.vector_store %arg13[%c0_6, %c17, %c0_7], %3 {strides = array<i32>} : memref<2x18x64xf32, #tpu.memory_space<vmem>>, vector<2x1x64xf32>,
    %c0_8 = arith.constant 0 : index
    %c1 = arith.constant 1 : index
    %c0_9 = arith.constant 0 : index
    %5 = vector.load %arg13[%c0_8, %c1, %c0_9] : memref<2x18x64xf32, #tpu.memory_space<vmem>>, vector<2x16x64xf32>
    tpu.vector_store %arg13[%c0_8, %c1, %c0_9], %0 {strides = array<i32>} : memref<2x18x64xf32, #tpu.memory_space<vmem>>, vector<2x16x64xf32>,
    %6 = vector.shape_cast %0 : vector<2x16x64xf32> to vector<32x64xf32>
    %7 = arith.truncf %6 : vector<32x64xf32> to vector<32x64xbf16>
    %c1_10 = arith.constant 1 : index
    %c0_11 = arith.constant 0 : index
    %c0_12 = arith.constant 0 : index
    %8 = vector.load %arg1[%c1_10, %c0_11, %c0_12] : memref<3x64x128xbf16, #tpu.memory_space<vmem>>, vector<1x64x128xbf16>
    %9 = vector.shape_cast %8 : vector<1x64x128xbf16> to vector<64x128xbf16>
    %cst_13 = arith.constant dense<0.000000e+00> : vector<32x128xf32>
    %10 = tpu.matmul %7, %9, %cst_13 {dimension_numbers = #tpu.dot_dimension_numbers<[1], [0], [0], [1], [0, 0, 1, 1], [], []>} : vector<32x64xbf16>, vector<64x128xbf16>, vector<32x128xf32> -> vector<32x128xf32>
    %c0_14 = arith.constant 0 : index
    %c0_15 = arith.constant 0 : index
    %c0_16 = arith.constant 0 : index
    %11 = vector.load %arg13[%c0_14, %c0_15, %c0_16] : memref<2x18x64xf32, #tpu.memory_space<vmem>>, vector<2x16x64xf32>
    %12 = vector.shape_cast %11 : vector<2x16x64xf32> to vector<32x64xf32>
    %13 = arith.truncf %12 : vector<32x64xf32> to vector<32x64xbf16>
    %c0_17 = arith.constant 0 : index
    %c0_18 = arith.constant 0 : index
    %c0_19 = arith.constant 0 : index
    %14 = vector.load %arg1[%c0_17, %c0_18, %c0_19] : memref<3x64x128xbf16, #tpu.memory_space<vmem>>, vector<1x64x128xbf16>
    %15 = vector.shape_cast %14 : vector<1x64x128xbf16> to vector<64x128xbf16>
    %cst_20 = arith.constant dense<0.000000e+00> : vector<32x128xf32>
    %16 = tpu.matmul %13, %15, %cst_20 {dimension_numbers = #tpu.dot_dimension_numbers<[1], [0], [0], [1], [0, 0, 1, 1], [], []>} : vector<32x64xbf16>, vector<64x128xbf16>, vector<32x128xf32> -> vector<32x128xf32>
    %17 = arith.addf %10, %16 : vector<32x128xf32>
    %c0_21 = arith.constant 0 : index
    %c2 = arith.constant 2 : index
    %c0_22 = arith.constant 0 : index
    %18 = vector.load %arg13[%c0_21, %c2, %c0_22] : memref<2x18x64xf32, #tpu.memory_space<vmem>>, vector<2x16x64xf32>
    %19 = vector.shape_cast %18 : vector<2x16x64xf32> to vector<32x64xf32>
    %20 = arith.truncf %19 : vector<32x64xf32> to vector<32x64xbf16>
    %c2_23 = arith.constant 2 : index
    %c0_24 = arith.constant 0 : index
    %c0_25 = arith.constant 0 : index
    %21 = vector.load %arg1[%c2_23, %c0_24, %c0_25] : memref<3x64x128xbf16, #tpu.memory_space<vmem>>, vector<1x64x128xbf16>
    %22 = vector.shape_cast %21 : vector<1x64x128xbf16> to vector<64x128xbf16>
    %cst_26 = arith.constant dense<0.000000e+00> : vector<32x128xf32>
    %23 = tpu.matmul %20, %22, %cst_26 {dimension_numbers = #tpu.dot_dimension_numbers<[1], [0], [0], [1], [0, 0, 1, 1], [], []>} : vector<32x64xbf16>, vector<64x128xbf16>, vector<32x128xf32> -> vector<32x128xf32>
    %24 = arith.addf %17, %23 : vector<32x128xf32>
    %cst_27 = arith.constant dense<0.000000e+00> : vector<128xf32>
    %25 = vector.multi_reduction <add>, %24, %cst_27 [0] : vector<32x128xf32> to vector<128xf32>
    %26 = vector.shape_cast %25 : vector<128xf32> to vector<1x128xf32>
    %c0_28 = arith.constant 0 : index
    %c0_29 = arith.constant 0 : index
    %27 = vector.load %arg10[%c0_28, %c0_29] : memref<128x8xf32, #tpu.memory_space<vmem>>, vector<128x8xf32>
    %cst_30 = arith.constant dense<0.000000e+00> : vector<1x8xf32>
    %28 = tpu.matmul %26, %27, %cst_30 {dimension_numbers = #tpu.dot_dimension_numbers<[1], [0], [0], [1], [0, 0, 1, 1], [], []>} : vector<1x128xf32>, vector<128x8xf32>, vector<1x8xf32> -> vector<1x8xf32>
    %cst_31 = arith.constant 0.001953125 : f32
    %29 = vector.broadcast %cst_31 : f32 to vector<1x8xf32>
    %30 = arith.mulf %28, %29 : vector<1x8xf32>
    %c0_32 = arith.constant 0 : index
    %c0_33 = arith.constant 0 : index
    %31 = vector.load %arg11[%c0_32, %c0_33] : memref<8x128xf32, #tpu.memory_space<vmem>>, vector<8x128xf32>
    %cst_34 = arith.constant dense<0.000000e+00> : vector<1x128xf32>
    %32 = tpu.matmul %30, %31, %cst_34 {dimension_numbers = #tpu.dot_dimension_numbers<[1], [0], [0], [1], [0, 0, 1, 1], [], []>} : vector<1x8xf32>, vector<8x128xf32>, vector<1x128xf32> -> vector<1x128xf32>
    %33 = vector.broadcast %32 : vector<1x128xf32> to vector<32x128xf32>
    %34 = arith.subf %24, %33 : vector<32x128xf32>
    %35 = arith.mulf %34, %34 : vector<32x128xf32>
    %cst_35 = arith.constant dense<0.000000e+00> : vector<128xf32>
    %36 = vector.multi_reduction <add>, %35, %cst_35 [0] : vector<32x128xf32> to vector<128xf32>
    %37 = vector.shape_cast %36 : vector<128xf32> to vector<1x128xf32>
    %c0_36 = arith.constant 0 : index
    %c0_37 = arith.constant 0 : index
    %38 = vector.load %arg10[%c0_36, %c0_37] : memref<128x8xf32, #tpu.memory_space<vmem>>, vector<128x8xf32>
    %cst_38 = arith.constant dense<0.000000e+00> : vector<1x8xf32>
    %39 = tpu.matmul %37, %38, %cst_38 {dimension_numbers = #tpu.dot_dimension_numbers<[1], [0], [0], [1], [0, 0, 1, 1], [], []>} : vector<1x128xf32>, vector<128x8xf32>, vector<1x8xf32> -> vector<1x8xf32>
    %cst_39 = arith.constant 0.001953125 : f32
    %40 = vector.broadcast %cst_39 : f32 to vector<1x8xf32>
    %41 = arith.mulf %39, %40 : vector<1x8xf32>
    %c0_40 = arith.constant 0 : index
    %c0_41 = arith.constant 0 : index
    %42 = vector.load %arg2[%c0_40, %c0_41] : memref<1x8xf32, #tpu.memory_space<vmem>>, vector<1x8xf32>
    %cst_42 = arith.constant 9.99999974E-6 : f32
    %43 = vector.broadcast %cst_42 : f32 to vector<1x8xf32>
    %44 = arith.addf %41, %43 : vector<1x8xf32>
    %45 = math.rsqrt %44 : vector<1x8xf32>
    %46 = arith.mulf %42, %45 : vector<1x8xf32>
    %c0_43 = arith.constant 0 : index
    %c0_44 = arith.constant 0 : index
    %47 = vector.load %arg11[%c0_43, %c0_44] : memref<8x128xf32, #tpu.memory_space<vmem>>, vector<8x128xf32>
    %cst_45 = arith.constant dense<0.000000e+00> : vector<1x128xf32>
    %48 = tpu.matmul %46, %47, %cst_45 {dimension_numbers = #tpu.dot_dimension_numbers<[1], [0], [0], [1], [0, 0, 1, 1], [], []>} : vector<1x8xf32>, vector<8x128xf32>, vector<1x128xf32> -> vector<1x128xf32>
    %c0_46 = arith.constant 0 : index
    %c0_47 = arith.constant 0 : index
    %49 = vector.load %arg3[%c0_46, %c0_47] : memref<1x8xf32, #tpu.memory_space<vmem>>, vector<1x8xf32>
    %c0_48 = arith.constant 0 : index
    %c0_49 = arith.constant 0 : index
    %50 = vector.load %arg11[%c0_48, %c0_49] : memref<8x128xf32, #tpu.memory_space<vmem>>, vector<8x128xf32>
    %cst_50 = arith.constant dense<0.000000e+00> : vector<1x128xf32>
    %51 = tpu.matmul %49, %50, %cst_50 {dimension_numbers = #tpu.dot_dimension_numbers<[1], [0], [0], [1], [0, 0, 1, 1], [], []>} : vector<1x8xf32>, vector<8x128xf32>, vector<1x128xf32> -> vector<1x128xf32>
    %52 = vector.broadcast %48 : vector<1x128xf32> to vector<32x128xf32>
    %53 = arith.mulf %34, %52 : vector<32x128xf32>
    %54 = vector.broadcast %51 : vector<1x128xf32> to vector<32x128xf32>
    %55 = arith.addf %53, %54 : vector<32x128xf32>
    %cst_51 = arith.constant 0.000000e+00 : f32
    %56 = vector.broadcast %cst_51 : f32 to vector<32x128xf32>
    %57 = arith.maximumf %55, %56 : vector<32x128xf32>
    %cst_52 = arith.constant 0.000000e+00 : f32
    %58 = vector.broadcast %cst_52 : f32 to vector<2x1x128xf32>
    %c0_53 = arith.constant 0 : index
    %c0_54 = arith.constant 0 : index
    %c0_55 = arith.constant 0 : index
    %59 = vector.load %arg14[%c0_53, %c0_54, %c0_55] : memref<2x18x128xf32, #tpu.memory_space<vmem>>, vector<2x1x128xf32>
    tpu.vector_store %arg14[%c0_53, %c0_54, %c0_55], %58 {strides = array<i32>} : memref<2x18x128xf32, #tpu.memory_space<vmem>>, vector<2x1x128xf32>,
    %cst_56 = arith.constant 0.000000e+00 : f32
    %60 = vector.broadcast %cst_56 : f32 to vector<2x1x128xf32>
    %c0_57 = arith.constant 0 : index
    %c17_58 = arith.constant 17 : index
    %c0_59 = arith.constant 0 : index
    %61 = vector.load %arg14[%c0_57, %c17_58, %c0_59] : memref<2x18x128xf32, #tpu.memory_space<vmem>>, vector<2x1x128xf32>
    tpu.vector_store %arg14[%c0_57, %c17_58, %c0_59], %60 {strides = array<i32>} : memref<2x18x128xf32, #tpu.memory_space<vmem>>, vector<2x1x128xf32>,
    %62 = vector.shape_cast %57 : vector<32x128xf32> to vector<2x16x128xf32>
    %c0_60 = arith.constant 0 : index
    %c1_61 = arith.constant 1 : index
    %c0_62 = arith.constant 0 : index
    %63 = vector.load %arg14[%c0_60, %c1_61, %c0_62] : memref<2x18x128xf32, #tpu.memory_space<vmem>>, vector<2x16x128xf32>
    tpu.vector_store %arg14[%c0_60, %c1_61, %c0_62], %62 {strides = array<i32>} : memref<2x18x128xf32, #tpu.memory_space<vmem>>, vector<2x16x128xf32>,
    %64 = arith.truncf %57 : vector<32x128xf32> to vector<32x128xbf16>
    %c1_63 = arith.constant 1 : index
    %c0_64 = arith.constant 0 : index
    %c0_65 = arith.constant 0 : index
    %65 = vector.load %arg4[%c1_63, %c0_64, %c0_65] : memref<3x128x128xbf16, #tpu.memory_space<vmem>>, vector<1x128x128xbf16>
    %66 = vector.shape_cast %65 : vector<1x128x128xbf16> to vector<128x128xbf16>
    %cst_66 = arith.constant dense<0.000000e+00> : vector<32x128xf32>
    %67 = tpu.matmul %64, %66, %cst_66 {dimension_numbers = #tpu.dot_dimension_numbers<[1], [0], [0], [1], [0, 0, 1, 1], [], []>} : vector<32x128xbf16>, vector<128x128xbf16>, vector<32x128xf32> -> vector<32x128xf32>
    %c0_67 = arith.constant 0 : index
    %c0_68 = arith.constant 0 : index
    %c0_69 = arith.constant 0 : index
    %68 = vector.load %arg14[%c0_67, %c0_68, %c0_69] : memref<2x18x128xf32, #tpu.memory_space<vmem>>, vector<2x16x128xf32>
    %69 = vector.shape_cast %68 : vector<2x16x128xf32> to vector<32x128xf32>
    %70 = arith.truncf %69 : vector<32x128xf32> to vector<32x128xbf16>
    %c0_70 = arith.constant 0 : index
    %c0_71 = arith.constant 0 : index
    %c0_72 = arith.constant 0 : index
    %71 = vector.load %arg4[%c0_70, %c0_71, %c0_72] : memref<3x128x128xbf16, #tpu.memory_space<vmem>>, vector<1x128x128xbf16>
    %72 = vector.shape_cast %71 : vector<1x128x128xbf16> to vector<128x128xbf16>
    %cst_73 = arith.constant dense<0.000000e+00> : vector<32x128xf32>
    %73 = tpu.matmul %70, %72, %cst_73 {dimension_numbers = #tpu.dot_dimension_numbers<[1], [0], [0], [1], [0, 0, 1, 1], [], []>} : vector<32x128xbf16>, vector<128x128xbf16>, vector<32x128xf32> -> vector<32x128xf32>
    %74 = arith.addf %67, %73 : vector<32x128xf32>
    %c0_74 = arith.constant 0 : index
    %c2_75 = arith.constant 2 : index
    %c0_76 = arith.constant 0 : index
    %75 = vector.load %arg14[%c0_74, %c2_75, %c0_76] : memref<2x18x128xf32, #tpu.memory_space<vmem>>, vector<2x16x128xf32>
    %76 = vector.shape_cast %75 : vector<2x16x128xf32> to vector<32x128xf32>
    %77 = arith.truncf %76 : vector<32x128xf32> to vector<32x128xbf16>
    %c2_77 = arith.constant 2 : index
    %c0_78 = arith.constant 0 : index
    %c0_79 = arith.constant 0 : index
    %78 = vector.load %arg4[%c2_77, %c0_78, %c0_79] : memref<3x128x128xbf16, #tpu.memory_space<vmem>>, vector<1x128x128xbf16>
    %79 = vector.shape_cast %78 : vector<1x128x128xbf16> to vector<128x128xbf16>
    %cst_80 = arith.constant dense<0.000000e+00> : vector<32x128xf32>
    %80 = tpu.matmul %77, %79, %cst_80 {dimension_numbers = #tpu.dot_dimension_numbers<[1], [0], [0], [1], [0, 0, 1, 1], [], []>} : vector<32x128xbf16>, vector<128x128xbf16>, vector<32x128xf32> -> vector<32x128xf32>
    %81 = arith.addf %74, %80 : vector<32x128xf32>
    %cst_81 = arith.constant dense<0.000000e+00> : vector<128xf32>
    %82 = vector.multi_reduction <add>, %81, %cst_81 [0] : vector<32x128xf32> to vector<128xf32>
    %83 = vector.shape_cast %82 : vector<128xf32> to vector<1x128xf32>
    %c0_82 = arith.constant 0 : index
    %c0_83 = arith.constant 0 : index
    %84 = vector.load %arg10[%c0_82, %c0_83] : memref<128x8xf32, #tpu.memory_space<vmem>>, vector<128x8xf32>
    %cst_84 = arith.constant dense<0.000000e+00> : vector<1x8xf32>
    %85 = tpu.matmul %83, %84, %cst_84 {dimension_numbers = #tpu.dot_dimension_numbers<[1], [0], [0], [1], [0, 0, 1, 1], [], []>} : vector<1x128xf32>, vector<128x8xf32>, vector<1x8xf32> -> vector<1x8xf32>
    %cst_85 = arith.constant 0.001953125 : f32
    %86 = vector.broadcast %cst_85 : f32 to vector<1x8xf32>
    %87 = arith.mulf %85, %86 : vector<1x8xf32>
    %c0_86 = arith.constant 0 : index
    %c0_87 = arith.constant 0 : index
    %88 = vector.load %arg11[%c0_86, %c0_87] : memref<8x128xf32, #tpu.memory_space<vmem>>, vector<8x128xf32>
    %cst_88 = arith.constant dense<0.000000e+00> : vector<1x128xf32>
    %89 = tpu.matmul %87, %88, %cst_88 {dimension_numbers = #tpu.dot_dimension_numbers<[1], [0], [0], [1], [0, 0, 1, 1], [], []>} : vector<1x8xf32>, vector<8x128xf32>, vector<1x128xf32> -> vector<1x128xf32>
    %90 = vector.broadcast %89 : vector<1x128xf32> to vector<32x128xf32>
    %91 = arith.subf %81, %90 : vector<32x128xf32>
    %92 = arith.mulf %91, %91 : vector<32x128xf32>
    %cst_89 = arith.constant dense<0.000000e+00> : vector<128xf32>
    %93 = vector.multi_reduction <add>, %92, %cst_89 [0] : vector<32x128xf32> to vector<128xf32>
    %94 = vector.shape_cast %93 : vector<128xf32> to vector<1x128xf32>
    %c0_90 = arith.constant 0 : index
    %c0_91 = arith.constant 0 : index
    %95 = vector.load %arg10[%c0_90, %c0_91] : memref<128x8xf32, #tpu.memory_space<vmem>>, vector<128x8xf32>
    %cst_92 = arith.constant dense<0.000000e+00> : vector<1x8xf32>
    %96 = tpu.matmul %94, %95, %cst_92 {dimension_numbers = #tpu.dot_dimension_numbers<[1], [0], [0], [1], [0, 0, 1, 1], [], []>} : vector<1x128xf32>, vector<128x8xf32>, vector<1x8xf32> -> vector<1x8xf32>
    %cst_93 = arith.constant 0.001953125 : f32
    %97 = vector.broadcast %cst_93 : f32 to vector<1x8xf32>
    %98 = arith.mulf %96, %97 : vector<1x8xf32>
    %c0_94 = arith.constant 0 : index
    %c0_95 = arith.constant 0 : index
    %99 = vector.load %arg5[%c0_94, %c0_95] : memref<1x8xf32, #tpu.memory_space<vmem>>, vector<1x8xf32>
    %cst_96 = arith.constant 9.99999974E-6 : f32
    %100 = vector.broadcast %cst_96 : f32 to vector<1x8xf32>
    %101 = arith.addf %98, %100 : vector<1x8xf32>
    %102 = math.rsqrt %101 : vector<1x8xf32>
    %103 = arith.mulf %99, %102 : vector<1x8xf32>
    %c0_97 = arith.constant 0 : index
    %c0_98 = arith.constant 0 : index
    %104 = vector.load %arg11[%c0_97, %c0_98] : memref<8x128xf32, #tpu.memory_space<vmem>>, vector<8x128xf32>
    %cst_99 = arith.constant dense<0.000000e+00> : vector<1x128xf32>
    %105 = tpu.matmul %103, %104, %cst_99 {dimension_numbers = #tpu.dot_dimension_numbers<[1], [0], [0], [1], [0, 0, 1, 1], [], []>} : vector<1x8xf32>, vector<8x128xf32>, vector<1x128xf32> -> vector<1x128xf32>
    %c0_100 = arith.constant 0 : index
    %c0_101 = arith.constant 0 : index
    %106 = vector.load %arg6[%c0_100, %c0_101] : memref<1x8xf32, #tpu.memory_space<vmem>>, vector<1x8xf32>
    %c0_102 = arith.constant 0 : index
    %c0_103 = arith.constant 0 : index
    %107 = vector.load %arg11[%c0_102, %c0_103] : memref<8x128xf32, #tpu.memory_space<vmem>>, vector<8x128xf32>
    %cst_104 = arith.constant dense<0.000000e+00> : vector<1x128xf32>
    %108 = tpu.matmul %106, %107, %cst_104 {dimension_numbers = #tpu.dot_dimension_numbers<[1], [0], [0], [1], [0, 0, 1, 1], [], []>} : vector<1x8xf32>, vector<8x128xf32>, vector<1x128xf32> -> vector<1x128xf32>
    %109 = vector.broadcast %105 : vector<1x128xf32> to vector<32x128xf32>
    %110 = arith.mulf %91, %109 : vector<32x128xf32>
    %111 = vector.broadcast %108 : vector<1x128xf32> to vector<32x128xf32>
    %112 = arith.addf %110, %111 : vector<32x128xf32>
    %113 = arith.truncf %6 : vector<32x64xf32> to vector<32x64xbf16>
    %c0_105 = arith.constant 0 : index
    %c0_106 = arith.constant 0 : index
    %114 = vector.load %arg7[%c0_105, %c0_106] : memref<64x128xbf16, #tpu.memory_space<vmem>>, vector<64x128xbf16>
    %cst_107 = arith.constant dense<0.000000e+00> : vector<32x128xf32>
    %115 = tpu.matmul %113, %114, %cst_107 {dimension_numbers = #tpu.dot_dimension_numbers<[1], [0], [0], [1], [0, 0, 1, 1], [], []>} : vector<32x64xbf16>, vector<64x128xbf16>, vector<32x128xf32> -> vector<32x128xf32>
    %cst_108 = arith.constant dense<0.000000e+00> : vector<128xf32>
    %116 = vector.multi_reduction <add>, %115, %cst_108 [0] : vector<32x128xf32> to vector<128xf32>
    %117 = vector.shape_cast %116 : vector<128xf32> to vector<1x128xf32>
    %c0_109 = arith.constant 0 : index
    %c0_110 = arith.constant 0 : index
    %118 = vector.load %arg10[%c0_109, %c0_110] : memref<128x8xf32, #tpu.memory_space<vmem>>, vector<128x8xf32>
    %cst_111 = arith.constant dense<0.000000e+00> : vector<1x8xf32>
    %119 = tpu.matmul %117, %118, %cst_111 {dimension_numbers = #tpu.dot_dimension_numbers<[1], [0], [0], [1], [0, 0, 1, 1], [], []>} : vector<1x128xf32>, vector<128x8xf32>, vector<1x8xf32> -> vector<1x8xf32>
    %cst_112 = arith.constant 0.001953125 : f32
    %120 = vector.broadcast %cst_112 : f32 to vector<1x8xf32>
    %121 = arith.mulf %119, %120 : vector<1x8xf32>
    %c0_113 = arith.constant 0 : index
    %c0_114 = arith.constant 0 : index
    %122 = vector.load %arg11[%c0_113, %c0_114] : memref<8x128xf32, #tpu.memory_space<vmem>>, vector<8x128xf32>
    %cst_115 = arith.constant dense<0.000000e+00> : vector<1x128xf32>
    %123 = tpu.matmul %121, %122, %cst_115 {dimension_numbers = #tpu.dot_dimension_numbers<[1], [0], [0], [1], [0, 0, 1, 1], [], []>} : vector<1x8xf32>, vector<8x128xf32>, vector<1x128xf32> -> vector<1x128xf32>
    %124 = vector.broadcast %123 : vector<1x128xf32> to vector<32x128xf32>
    %125 = arith.subf %115, %124 : vector<32x128xf32>
    %126 = arith.mulf %125, %125 : vector<32x128xf32>
    %cst_116 = arith.constant dense<0.000000e+00> : vector<128xf32>
    %127 = vector.multi_reduction <add>, %126, %cst_116 [0] : vector<32x128xf32> to vector<128xf32>
    %128 = vector.shape_cast %127 : vector<128xf32> to vector<1x128xf32>
    %c0_117 = arith.constant 0 : index
    %c0_118 = arith.constant 0 : index
    %129 = vector.load %arg10[%c0_117, %c0_118] : memref<128x8xf32, #tpu.memory_space<vmem>>, vector<128x8xf32>
    %cst_119 = arith.constant dense<0.000000e+00> : vector<1x8xf32>
    %130 = tpu.matmul %128, %129, %cst_119 {dimension_numbers = #tpu.dot_dimension_numbers<[1], [0], [0], [1], [0, 0, 1, 1], [], []>} : vector<1x128xf32>, vector<128x8xf32>, vector<1x8xf32> -> vector<1x8xf32>
    %cst_120 = arith.constant 0.001953125 : f32
    %131 = vector.broadcast %cst_120 : f32 to vector<1x8xf32>
    %132 = arith.mulf %130, %131 : vector<1x8xf32>
    %c0_121 = arith.constant 0 : index
    %c0_122 = arith.constant 0 : index
    %133 = vector.load %arg8[%c0_121, %c0_122] : memref<1x8xf32, #tpu.memory_space<vmem>>, vector<1x8xf32>
    %cst_123 = arith.constant 9.99999974E-6 : f32
    %134 = vector.broadcast %cst_123 : f32 to vector<1x8xf32>
    %135 = arith.addf %132, %134 : vector<1x8xf32>
    %136 = math.rsqrt %135 : vector<1x8xf32>
    %137 = arith.mulf %133, %136 : vector<1x8xf32>
    %c0_124 = arith.constant 0 : index
    %c0_125 = arith.constant 0 : index
    %138 = vector.load %arg11[%c0_124, %c0_125] : memref<8x128xf32, #tpu.memory_space<vmem>>, vector<8x128xf32>
    %cst_126 = arith.constant dense<0.000000e+00> : vector<1x128xf32>
    %139 = tpu.matmul %137, %138, %cst_126 {dimension_numbers = #tpu.dot_dimension_numbers<[1], [0], [0], [1], [0, 0, 1, 1], [], []>} : vector<1x8xf32>, vector<8x128xf32>, vector<1x128xf32> -> vector<1x128xf32>
    %c0_127 = arith.constant 0 : index
    %c0_128 = arith.constant 0 : index
    %140 = vector.load %arg9[%c0_127, %c0_128] : memref<1x8xf32, #tpu.memory_space<vmem>>, vector<1x8xf32>
    %c0_129 = arith.constant 0 : index
    %c0_130 = arith.constant 0 : index
    %141 = vector.load %arg11[%c0_129, %c0_130] : memref<8x128xf32, #tpu.memory_space<vmem>>, vector<8x128xf32>
    %cst_131 = arith.constant dense<0.000000e+00> : vector<1x128xf32>
    %142 = tpu.matmul %140, %141, %cst_131 {dimension_numbers = #tpu.dot_dimension_numbers<[1], [0], [0], [1], [0, 0, 1, 1], [], []>} : vector<1x8xf32>, vector<8x128xf32>, vector<1x128xf32> -> vector<1x128xf32>
    %143 = vector.broadcast %139 : vector<1x128xf32> to vector<32x128xf32>
    %144 = arith.mulf %125, %143 : vector<32x128xf32>
    %145 = vector.broadcast %142 : vector<1x128xf32> to vector<32x128xf32>
    %146 = arith.addf %144, %145 : vector<32x128xf32>
    %147 = arith.addf %112, %146 : vector<32x128xf32>
    %cst_132 = arith.constant 0.000000e+00 : f32
    %148 = vector.broadcast %cst_132 : f32 to vector<32x128xf32>
    %149 = arith.maximumf %147, %148 : vector<32x128xf32>
    %c0_133 = arith.constant 0 : index
    %c0_134 = arith.constant 0 : index
    %150 = vector.load %arg12[%c0_133, %c0_134] : memref<32x128xf32, #tpu.memory_space<vmem>>, vector<32x128xf32>
    tpu.vector_store %arg12[%c0_133, %c0_134], %149 {strides = array<i32>} : memref<32x128xf32, #tpu.memory_space<vmem>>, vector<32x128xf32>,
    return
  }
}

</mosaic_0001>

<bundles_post_ra>
// kernel: tile.9
= control target key start
LH: loop header
LB: loop body
LE: loop exit
PB: predicated region body
PF: predicated region fallthrough
CT: control target
= control target key end

     0   :  { %vm6_vm0 = vcmask 1043458   ;;  %vm10_vm1 = vcmask 1045508   ;;  %vm14_vm2 = vcmask 1047558   ;;  %s19_s6 = smov 3  ;;  %s22_s7 = smov 12  ;;  %vm16_vm3 = vcmask 64512   ;;  %s736_s0 = inlined_call_operand.vmem [shape: f32[8,16,8], index: 0, kind: input, shape index: {}]   ;;  %s737_s1 = inlined_call_operand.vmem [shape: f32[8,128], index: 1, kind: output, shape index: {}]  }
   0x1   :  { %v348_v0 = vld [vmem:[%s736_s0 + $0xf] ss:$16 sm:%s19_s6]   ;;  %s27_s12 = smov 48  ;;  %s32_s13 = smov 192  ;;  %vm38_vm4 = vcmask 1048512   ;;  %vm60_vm5 = vcmask 982912  }
   0x2   :  { %v349_v1 = vld [vmem:[%s736_s0 + $0xf] ss:$16 sm:%s22_s7]   ;;  %s63_s18 = smov 3  ;;  %s66_s21 = smov 12  ;;  %vm82_vm6 = vcmask 917312   ;;  %vm104_vm7 = vcmask 851712  }
   0x3   :  { %v25_v2 = vsel %vm6_vm0, %v349_v1, %v348_v0  ;;  %v350_v3 = vld [vmem:[%s736_s0 + $0xf] ss:$16 sm:%s27_s12]   ;;  %v356_v6 = vld [vmem:[%s736_s0 + $0xd] ss:$16 sm:%s63_s18]   ;;  %s71_s22 = smov 48  ;;  %s76_s27 = smov 192 }
   0x4   :  { %v351_v4 = vld [vmem:[%s736_s0 + $0xf] ss:$16 sm:%s32_s13]   ;;  %v30_v5 = vsel %vm10_vm1, %v350_v3, %v25_v2  ;;  %v357_v8 = vld [vmem:[%s736_s0 + $0xd] ss:$16 sm:%s66_s21]   ;;  %s423_s28 = smov 120   ;;  %s41_s2 = smov 3 }
   0x5   :  { %v35_v7 = vsel %vm14_vm2, %v351_v4, %v30_v5  ;;  %v358_v9 = vld [vmem:[%s736_s0 + $0xd] ss:$16 sm:%s71_s22]   ;;  %v69_v10 = vsel %vm6_vm0, %v357_v8, %v356_v6  ;;  %s44_s3 = smov 12  ;;  %v352_v13 = vld [vmem:[%s736_s0 + $0xe] ss:$16 sm:%s41_s2]   ;;  %s49_s8 = smov 48 }
   0x6   :  { %36 = vrot.lane.b32.xlu0 %v35_v7, %s423_s28  ;;  %v359_v11 = vld [vmem:[%s736_s0 + $0xd] ss:$16 sm:%s76_s27]   ;;  %v74_v12 = vsel %vm10_vm1, %v358_v9, %v69_v10  ;;  %s54_s9 = smov 192  ;;  %s85_s14 = smov 3  ;;  %vm126_vm8 = vcmask 786112   ;;  %vm148_vm9 = vcmask 720512  }
   0x7   :  { %v353_v14 = vld [vmem:[%s736_s0 + $0xe] ss:$16 sm:%s44_s3]   ;;  %v79_v15 = vsel %vm14_vm2, %v359_v11, %v74_v12  ;;  %s424_s15 = smov 104   ;;  %v360_v20 = vld [vmem:[%s736_s0 + $0xc] ss:$16 sm:%s85_s14]   ;;  %s88_s18 = smov 12 }
   0x8   :  { %v47_v16 = vsel %vm6_vm0, %v353_v14, %v352_v13  ;;  %v354_v17 = vld [vmem:[%s736_s0 + $0xe] ss:$16 sm:%s49_s8]   ;;  %80 = vrot.lane.b32.xlu1 %v79_v15, %s424_s15  ;;  %s93_s19 = smov 48  ;;  %s98_s24 = smov 192  ;;  %vm170_vm10 = vcmask 654912   ;;  %vm192_vm11 = vcmask 589312  }
   0x9   :  { %v355_v18 = vld [vmem:[%s736_s0 + $0xe] ss:$16 sm:%s54_s9]   ;;  %v52_v19 = vsel %vm10_vm1, %v354_v17, %v47_v16  ;;  %v361_v22 = vld [vmem:[%s736_s0 + $0xc] ss:$16 sm:%s88_s18]   ;;  %s425_s25 = smov 112   ;;  %s107_s28 = smov 3 }
   0xa   :  { %v57_v21 = vsel %vm14_vm2, %v355_v18, %v52_v19  ;;  %v362_v23 = vld [vmem:[%s736_s0 + $0xc] ss:$16 sm:%s93_s19]   ;;  %v91_v24 = vsel %vm6_vm0, %v361_v22, %v360_v20  ;;  %s110_s29 = smov 12  ;;  %v364_v27 = vld [vmem:[%s736_s0 + $0xb] ss:$16 sm:%s107_s28]   ;;  %s115_s5 = smov 48 }
   0xb   :  { %58 = vrot.lane.b32.xlu0 %v57_v21, %s425_s25  ;;  %v363_v25 = vld [vmem:[%s736_s0 + $0xc] ss:$16 sm:%s98_s24]   ;;  %v96_v26 = vsel %vm10_vm1, %v362_v23, %v91_v24  ;;  %s120_s6 = smov 192  ;;  %s129_s11 = smov 3  ;;  %vm214_vm12 = vcmask 523712   ;;  %vm236_vm13 = vcmask 458112  }
   0xc   :  { %v365_v28 = vld [vmem:[%s736_s0 + $0xb] ss:$16 sm:%s110_s29]   ;;  %v101_v29 = vsel %vm14_vm2, %v363_v25, %v96_v26  ;;  %s426_s12 = smov 96   ;;  %v368_v34 = vld [vmem:[%s736_s0 + $0xa] ss:$16 sm:%s129_s11]   ;;  %s132_s15 = smov 12 }
   0xd   :  { %v113_v30 = vsel %vm6_vm0, %v365_v28, %v364_v27  ;;  %v366_v31 = vld [vmem:[%s736_s0 + $0xb] ss:$16 sm:%s115_s5]   ;;  %102 = vrot.lane.b32.xlu1 %v101_v29, %s426_s12  ;;  %s137_s16 = smov 48  ;;  %s142_s21 = smov 192  ;;  %vm258_vm14 = vcmask 392512   ;;  %vm280_vm15 = vcmask 326912  }
   0xe   :  { %v367_v32 = vld [vmem:[%s736_s0 + $0xb] ss:$16 sm:%s120_s6]   ;;  %v118_v33 = vsel %vm10_vm1, %v366_v31, %v113_v30  ;;  %v369_v36 = vld [vmem:[%s736_s0 + $0xa] ss:$16 sm:%s132_s15]   ;;  %s427_s22 = smov 88   ;;  %s151_s25 = smov 3 }
   0xf   :  { %v123_v35 = vsel %vm14_vm2, %v367_v32, %v118_v33  ;;  %v370_v37 = vld [vmem:[%s736_s0 + $0xa] ss:$16 sm:%s137_s16]   ;;  %v135_v38 = vsel %vm6_vm0, %v369_v36, %v368_v34  ;;  %s154_s26 = smov 12  ;;  %v372_v41 = vld [vmem:[%s736_s0 + $0x9] ss:$16 sm:%s151_s25]   ;;  %s159_s2 = smov 48 }
  0x10   :  { %124 = vrot.lane.b32.xlu0 %v123_v35, %s427_s22  ;;  %v371_v39 = vld [vmem:[%s736_s0 + $0xa] ss:$16 sm:%s142_s21]   ;;  %v140_v40 = vsel %vm10_vm1, %v370_v37, %v135_v38  ;;  %s164_s3 = smov 192  ;;  %s173_s8 = smov 3 }
  0x11   :  { %v373_v42 = vld [vmem:[%s736_s0 + $0x9] ss:$16 sm:%s154_s26]   ;;  %v145_v43 = vsel %vm14_vm2, %v371_v39, %v140_v40  ;;  %s428_s9 = smov 80   ;;  %v376_v48 = vld [vmem:[%s736_s0 + $0x8] ss:$16 sm:%s173_s8]   ;;  %s176_s12 = smov 12 }
  0x12   :  { %v157_v44 = vsel %vm6_vm0, %v373_v42, %v372_v41  ;;  %v374_v45 = vld [vmem:[%s736_s0 + $0x9] ss:$16 sm:%s159_s2]   ;;  %146 = vrot.lane.b32.xlu1 %v145_v43, %s428_s9  ;;  %s181_s13 = smov 48  ;;  %s186_s18 = smov 192 }
  0x13   :  { %v375_v46 = vld [vmem:[%s736_s0 + $0x9] ss:$16 sm:%s164_s3]   ;;  %v162_v47 = vsel %vm10_vm1, %v374_v45, %v157_v44  ;;  %v377_v50 = vld [vmem:[%s736_s0 + $0x8] ss:$16 sm:%s176_s12]   ;;  %s429_s19 = smov 72   ;;  %s195_s22 = smov 3 }
  0x14   :  { %v167_v49 = vsel %vm14_vm2, %v375_v46, %v162_v47  ;;  %v378_v51 = vld [vmem:[%s736_s0 + $0x8] ss:$16 sm:%s181_s13]   ;;  %v179_v52 = vsel %vm6_vm0, %v377_v50, %v376_v48  ;;  %s198_s23 = smov 12  ;;  %v380_v55 = vld [vmem:[%s736_s0 + $0x7] ss:$16 sm:%s195_s22]   ;;  %s203_s28 = smov 48 }
  0x15   :  { %168 = vrot.lane.b32.xlu0 %v167_v49, %s429_s19  ;;  %v379_v53 = vld [vmem:[%s736_s0 + $0x8] ss:$16 sm:%s186_s18]   ;;  %v184_v54 = vsel %vm10_vm1, %v378_v51, %v179_v52  ;;  %s208_s29 = smov 192  ;;  %s217_s5 = smov 3 }
  0x16   :  { %v381_v56 = vld [vmem:[%s736_s0 + $0x7] ss:$16 sm:%s198_s23]   ;;  %v189_v57 = vsel %vm14_vm2, %v379_v53, %v184_v54  ;;  %s430_s6 = smov 64   ;;  %v384_v62 = vld [vmem:[%s736_s0 + $0x6] ss:$16 sm:%s217_s5]   ;;  %s220_s9 = smov 12 }
  0x17   :  { %v201_v58 = vsel %vm6_vm0, %v381_v56, %v380_v55  ;;  %v382_v59 = vld [vmem:[%s736_s0 + $0x7] ss:$16 sm:%s203_s28]   ;;  %190 = vrot.lane.b32.xlu1 %v189_v57, %s430_s6  ;;  %s225_s10 = smov 48  ;;  %s230_s15 = smov 192 }
  0x18   :  { %v383_v60 = vld [vmem:[%s736_s0 + $0x7] ss:$16 sm:%s208_s29]   ;;  %v206_v61 = vsel %vm10_vm1, %v382_v59, %v201_v58  ;;  %v385_v0 = vld [vmem:[%s736_s0 + $0x6] ss:$16 sm:%s220_s9]   ;;  %s431_s16 = smov 56   ;;  %s239_s19 = smov 3 }
  0x19   :  { %v211_v63 = vsel %vm14_vm2, %v383_v60, %v206_v61  ;;  %v386_v1 = vld [vmem:[%s736_s0 + $0x6] ss:$16 sm:%s225_s10]   ;;  %v223_v2 = vsel %vm6_vm0, %v385_v0, %v384_v62  ;;  %s242_s20 = smov 12  ;;  %v388_v5 = vld [vmem:[%s736_s0 + $0x5] ss:$16 sm:%s239_s19]   ;;  %s247_s25 = smov 48 }
  0x1a   :  { %212 = vrot.lane.b32.xlu0 %v211_v63, %s431_s16  ;;  %v387_v3 = vld [vmem:[%s736_s0 + $0x6] ss:$16 sm:%s230_s15]   ;;  %v228_v4 = vsel %vm10_vm1, %v386_v1, %v223_v2  ;;  %s252_s26 = smov 192  ;;  %s261_s2 = smov 3 }
  0x1b   :  { %v389_v6 = vld [vmem:[%s736_s0 + $0x5] ss:$16 sm:%s242_s20]   ;;  %v233_v7 = vsel %vm14_vm2, %v387_v3, %v228_v4  ;;  %s432_s3 = smov 48   ;;  %v392_v12 = vld [vmem:[%s736_s0 + $0x4] ss:$16 sm:%s261_s2]   ;;  %s264_s6 = smov 12 }
  0x1c   :  { %v245_v8 = vsel %vm6_vm0, %v389_v6, %v388_v5  ;;  %v390_v9 = vld [vmem:[%s736_s0 + $0x5] ss:$16 sm:%s247_s25]   ;;  %234 = vrot.lane.b32.xlu1 %v233_v7, %s432_s3  ;;  %s269_s7 = smov 48  ;;  %s274_s12 = smov 192 }
  0x1d   :  { %v391_v10 = vld [vmem:[%s736_s0 + $0x5] ss:$16 sm:%s252_s26]   ;;  %v250_v11 = vsel %vm10_vm1, %v390_v9, %v245_v8  ;;  %v393_v14 = vld [vmem:[%s736_s0 + $0x4] ss:$16 sm:%s264_s6]   ;;  %s433_s13 = smov 40   ;;  %s283_s16 = smov 3 }
  0x1e   :  { %v255_v13 = vsel %vm14_vm2, %v391_v10, %v250_v11  ;;  %v394_v15 = vld [vmem:[%s736_s0 + $0x4] ss:$16 sm:%s269_s7]   ;;  %v267_v16 = vsel %vm6_vm0, %v393_v14, %v392_v12  ;;  %s286_s17 = smov 12  ;;  %v396_v19 = vld [vmem:[%s736_s0 + $0x3] ss:$16 sm:%s283_s16]   ;;  %s291_s22 = smov 48 }
  0x1f   :  { %256 = vrot.lane.b32.xlu0 %v255_v13, %s433_s13  ;;  %v395_v17 = vld [vmem:[%s736_s0 + $0x4] ss:$16 sm:%s274_s12]   ;;  %v272_v18 = vsel %vm10_vm1, %v394_v15, %v267_v16  ;;  %s296_s23 = smov 192  ;;  %s305_s28 = smov 3 }
  0x20   :  { %v397_v20 = vld [vmem:[%s736_s0 + $0x3] ss:$16 sm:%s286_s17]   ;;  %v277_v21 = vsel %vm14_vm2, %v395_v17, %v272_v18  ;;  %s434_s29 = smov 32   ;;  %v400_v26 = vld [vmem:[%s736_s0 + $0x2] ss:$16 sm:%s305_s28]   ;;  %s308_s3 = smov 12 }
  0x21   :  { %v289_v22 = vsel %vm6_vm0, %v397_v20, %v396_v19  ;;  %v398_v23 = vld [vmem:[%s736_s0 + $0x3] ss:$16 sm:%s291_s22]   ;;  %278 = vrot.lane.b32.xlu1 %v277_v21, %s434_s29  ;;  %s313_s4 = smov 48  ;;  %s318_s9 = smov 192 }
  0x22   :  { %v399_v24 = vld [vmem:[%s736_s0 + $0x3] ss:$16 sm:%s296_s23]   ;;  %v294_v25 = vsel %vm10_vm1, %v398_v23, %v289_v22  ;;  %v401_v28 = vld [vmem:[%s736_s0 + $0x2] ss:$16 sm:%s308_s3]   ;;  %s435_s10 = smov 24   ;;  %s327_s13 = smov 3 }
  0x23   :  { %v299_v27 = vsel %vm14_vm2, %v399_v24, %v294_v25  ;;  %v402_v29 = vld [vmem:[%s736_s0 + $0x2] ss:$16 sm:%s313_s4]   ;;  %v311_v30 = vsel %vm6_vm0, %v401_v28, %v400_v26  ;;  %s330_s14 = smov 12  ;;  %v404_v33 = vld [vmem:[%s736_s0 + $0x1] ss:$16 sm:%s327_s13]   ;;  %s335_s19 = smov 48 }
  0x24   :  { %300 = vrot.lane.b32.xlu0 %v299_v27, %s435_s10  ;;  %v403_v31 = vld [vmem:[%s736_s0 + $0x2] ss:$16 sm:%s318_s9]   ;;  %v316_v32 = vsel %vm10_vm1, %v402_v29, %v311_v30  ;;  %s340_s20 = smov 192  ;;  %s2_s25 = smov 3 }
  0x25   :  { %v405_v34 = vld [vmem:[%s736_s0 + $0x1] ss:$16 sm:%s330_s14]   ;;  %v321_v35 = vsel %vm14_vm2, %v403_v31, %v316_v32  ;;  %s436_s26 = smov 16   ;;  %s4_s27 = smov 12  ;;  %v3_v40 = vld [vmem:[%s736_s0] ss:$16 sm:%s2_s25]  }
  0x26   :  { %v333_v36 = vsel %vm6_vm0, %v405_v34, %v404_v33  ;;  %v406_v37 = vld [vmem:[%s736_s0 + $0x1] ss:$16 sm:%s335_s19]   ;;  %322 = vrot.lane.b32.xlu1 %v321_v35, %s436_s26  ;;  %s8_s28 = smov 48  ;;  %s12_s2 = smov 192 }
  0x27   :  { %v407_v38 = vld [vmem:[%s736_s0 + $0x1] ss:$16 sm:%s340_s20]   ;;  %v338_v39 = vsel %vm10_vm1, %v406_v37, %v333_v36  ;;  %v5_v42 = vld [vmem:[%s736_s0] ss:$16 sm:%s4_s27]   ;;  %s437_s7 = smov 8  }
  0x28   :  { %v343_v41 = vsel %vm14_vm2, %v407_v38, %v338_v39  ;;  %v9_v43 = vld [vmem:[%s736_s0] ss:$16 sm:%s8_s28]   ;;  %v7_v44 = vsel %vm6_vm0, %v5_v42, %v3_v40  ;;  %vm302_vm0 = vcmask 261312  }
  0x29   :  { %344 = vrot.lane.b32.xlu0 %v343_v41, %s437_s7  ;;  %v13_v45 = vld [vmem:[%s736_s0] ss:$16 sm:%s12_s2]   ;;  %v11_v46 = vsel %vm10_vm1, %v9_v43, %v7_v44  ;;  %vm324_vm1 = vcmask 195712  }
  0x2a   :  { %v15_v47 = vsel %vm14_vm2, %v13_v45, %v11_v46  ;;  %vm346_vm2 = vcmask 130112  }
  0x2b   :  { %17 = vst.msk [vmem:[%s737_s1] sm:$0xff] %vm16_vm3, %v15_v47  }
  0x78   :  { %v37_v48 = vpop.permute.xlu0 %36  }
  0x79   :  { %39 = vst.msk [vmem:[%s737_s1] sm:$0xff] %vm38_vm4, %v37_v48  }
  0x7a   :  { %v81_v49 = vpop.permute.xlu1 %80  }
  0x7d   :  { %v59_v50 = vpop.permute.xlu0 %58  }
  0x7e   :  { %61 = vst.msk [vmem:[%s737_s1] sm:$0xff] %vm60_vm5, %v59_v50  }
  0x7f   :  { %83 = vst.msk [vmem:[%s737_s1] sm:$0xff] %vm82_vm6, %v81_v49   ;;  %v103_v51 = vpop.permute.xlu1 %102  }
  0x80   :  { %105 = vst.msk [vmem:[%s737_s1] sm:$0xff] %vm104_vm7, %v103_v51  }
  0x82   :  { %v125_v52 = vpop.permute.xlu0 %124  }
  0x83   :  { %127 = vst.msk [vmem:[%s737_s1] sm:$0xff] %vm126_vm8, %v125_v52  }
  0x84   :  { %v147_v53 = vpop.permute.xlu1 %146  }
  0x85   :  { %149 = vst.msk [vmem:[%s737_s1] sm:$0xff] %vm148_vm9, %v147_v53  }
  0x87   :  { %v169_v54 = vpop.permute.xlu0 %168  }
  0x88   :  { %171 = vst.msk [vmem:[%s737_s1] sm:$0xff] %vm170_vm10, %v169_v54  }
  0x89   :  { %v191_v55 = vpop.permute.xlu1 %190  }
  0x8a   :  { %193 = vst.msk [vmem:[%s737_s1] sm:$0xff] %vm192_vm11, %v191_v55  }
  0x8c   :  { %v213_v56 = vpop.permute.xlu0 %212  }
  0x8d   :  { %215 = vst.msk [vmem:[%s737_s1] sm:$0xff] %vm214_vm12, %v213_v56  }
  0x8e   :  { %v235_v57 = vpop.permute.xlu1 %234  }
  0x8f   :  { %237 = vst.msk [vmem:[%s737_s1] sm:$0xff] %vm236_vm13, %v235_v57  }
  0x91   :  { %v257_v58 = vpop.permute.xlu0 %256  }
  0x92   :  { %259 = vst.msk [vmem:[%s737_s1] sm:$0xff] %vm258_vm14, %v257_v58  }
  0x93   :  { %v279_v59 = vpop.permute.xlu1 %278  }
  0x94   :  { %281 = vst.msk [vmem:[%s737_s1] sm:$0xff] %vm280_vm15, %v279_v59  }
  0x96   :  { %v301_v60 = vpop.permute.xlu0 %300  }
  0x97   :  { %303 = vst.msk [vmem:[%s737_s1] sm:$0xff] %vm302_vm0, %v301_v60  }
  0x98   :  { %v323_v61 = vpop.permute.xlu1 %322  }
  0x99   :  { %325 = vst.msk [vmem:[%s737_s1] sm:$0xff] %vm324_vm1, %v323_v61  }
  0x9b   :  { %v345_v62 = vpop.permute.xlu0 %344  }
  0x9c   :  { %347 = vst.msk [vmem:[%s737_s1] sm:$0xff] %vm346_vm2, %v345_v62  }

// kernel: resblk_forward.1
= control target key start
LH: loop header
LB: loop body
LE: loop exit
PB: predicated region body
PF: predicated region fallthrough
CT: control target
= control target key end

     0   :  { %vm46_vm0 = vcmask 516096   ;;  %v2783_v1 = vmov 0.0   ;;  %vm51_vm1 = vcmask 523264   ;;  %vm2784_vm2 = vmmov 0   ;;  %s3487_s1 = inlined_call_operand.vmem [shape: bf16[3,64,128], index: 1, kind: input, shape index: {}]   ;;  %s3488_s0 = inlined_call_operand.vmem [shape: f32[2,16,64], index: 0, kind: input, shape index: {}]   ;;  %s3489_s10 = inlined_call_operand.vmem [shape: f32[128,8], index: 10, kind: input, shape index: {}]   ;;  %s3490_s11 = inlined_call_operand.vmem [shape: f32[8,128], index: 11, kind: input, shape index: {}]   ;;  %s3491_s4 = inlined_call_operand.vmem [shape: bf16[3,128,128], index: 4, kind: input, shape index: {}]   ;;  %s3492_s2 = inlined_call_operand.vmem [shape: f32[1,8], index: 2, kind: input, shape index: {}]   ;;  %s3493_s3 = inlined_call_operand.vmem [shape: f32[1,8], index: 3, kind: input, shape index: {}]   ;;  %s3494_s7 = inlined_call_operand.vmem [shape: bf16[64,128], index: 7, kind: input, shape index: {}]   ;;  %s3495_s5 = inlined_call_operand.vmem [shape: f32[1,8], index: 5, kind: input, shape index: {}]   ;;  %s3496_s6 = inlined_call_operand.vmem [shape: f32[1,8], index: 6, kind: input, shape index: {}]   ;;  %s3497_s8 = inlined_call_operand.vmem [shape: f32[1,8], index: 8, kind: input, shape index: {}]   ;;  %s3498_s9 = inlined_call_operand.vmem [shape: f32[1,8], index: 9, kind: input, shape index: {}]   ;;  %s3499_s12 = inlined_call_operand.vmem [shape: f32[32,128], index: 12, kind: output, shape index: {}]  }
   0x1   :  { %v2720_v0 = vld [vmem:[%s3487_s1 + $0x18] sm:$0xff]   ;;  %47 = vst.msk [vmem:[#allocation2] sm:$0x1] %vm46_vm0, %v2783_v1  ;;  %50 = vst.msk [vmem:[#allocation2 + $0x29] sm:$0x1] %vm46_vm0, %v2783_v1  ;;  %v2722_v3 = vld [vmem:[%s3487_s1 + $0x10] sm:$0xff]  }
   0x2   :  { %48 = vst.msk [vmem:[#allocation2 + $0x18] sm:$0x1] %vm46_vm0, %v2783_v1  ;;  %49 = vst.msk [vmem:[#allocation2 + $0x11] sm:$0x1] %vm46_vm0, %v2783_v1  ;;  %v2721_v2 = vld [vmem:[%s3487_s1 + $0x38] sm:$0xff]   ;;  %2355 = vmatprep.subr.bf16.mxu0 %v2720_v0  ;;  %v2723_v4 = vld [vmem:[%s3487_s1 + $0x30] sm:$0xff]  }
   0x3   :  { %771 = vst [vmem:[#allocation3] sm:$0x1] %v2783_v1  ;;  %772 = vst [vmem:[#allocation3 + $0x18] sm:$0x1] %v2783_v1  ;;  %2367 = vmatprep.subr.bf16.mxu1 %v2721_v2  ;;  %2356 = vmatpush3.bf16.msra.mxu0 %v2720_v0  ;;  %v2724_v5 = vld [vmem:[%s3487_s1 + $0x8] sm:$0xff]   ;;  %v2726_v7 = vld [vmem:[%s3487_s1] sm:$0xff]  }
   0x4   :  { %773 = vst [vmem:[#allocation3 + $0x11] sm:$0x1] %v2783_v1  ;;  %774 = vst [vmem:[#allocation3 + $0x29] sm:$0x1] %v2783_v1  ;;  %2368 = vmatpush3.bf16.msra.mxu1 %v2721_v2  ;;  %2357 = vmatprep.subr.bf16.mxu0 %v2722_v3  ;;  %v2725_v6 = vld [vmem:[%s3487_s1 + $0x28] sm:$0xff]   ;;  %v2727_v8 = vld [vmem:[%s3487_s1 + $0x20] sm:$0xff]  }
   0x5   :  { %2369 = vmatprep.subr.bf16.mxu1 %v2723_v4  ;;  %v42_v9 = vld [vmem:[%s3488_s0] sm:$0xff]  ;;  %v43_v10 = vld [vmem:[%s3488_s0 + $0x8] sm:$0xff]  ;;  %v44_v11 = vld [vmem:[%s3488_s0 + $0x10] sm:$0xff]  ;;  %vm434_vm3 = vcmask 64512  }
   0x6   :  { %52 = vst.msk [vmem:[#allocation2 + $0x1] sm:$0xff] %vm51_vm1, %v42_v9  ;;  %53 = vst.msk [vmem:[#allocation2 + $0x9] sm:$0xff] %vm51_vm1, %v43_v10  ;;  %v2893_v12 = vpack.c.bf16 %v43_v10, %v42_v9  ;;  %v45_v13 = vld [vmem:[%s3488_s0 + $0x18] sm:$0xff]  ;;  %v2729_v24 = vld [vmem:[%s3487_s1 + $0x50] sm:$0xff]  }
   0x7   :  { %2358 = vmatpush3.bf16.msra.mxu0 %v2722_v3  ;;  %54 = vst.msk [vmem:[#allocation2 + $0x19] sm:$0xff] %vm51_vm1, %v44_v11  ;;  %55 = vst.msk [vmem:[#allocation2 + $0x21] sm:$0xff] %vm51_vm1, %v45_v13  ;;  %v2728_v14 = vld [vmem:[%s3487_s1 + $0x58] sm:$0xff]   ;;  %v2905_v15 = vpack.c.bf16 %v45_v13, %v44_v11  ;;  %v2730_v26 = vld [vmem:[%s3487_s1 + $0x48] sm:$0xff]  }
   0x8   :  { %2370 = vmatpush3.bf16.msra.mxu1 %v2723_v4  ;;  %2359 = vmatprep.subr.bf16.mxu0 %v2724_v5  ;;  %v2731_v27 = vld [vmem:[%s3487_s1 + $0x40] sm:$0xff]   ;;  %v2927_v31 = vld [vmem:[%s3489_s10 + $0x78] sm:$0xff]  ;;  %v2932_v32 = vld [vmem:[%s3489_s10 + $0x70] sm:$0xff] }
   0x9   :  { %2371 = vmatprep.subr.bf16.mxu1 %v2725_v6  ;;  %2375 = vmatprep.mubr.msk.bf16.mxu1 %vm51_vm1, %v2893_v12  ;;  %v2941_v33 = vld [vmem:[%s3489_s10 + $0x68] sm:$0xff]  ;;  %v2948_v34 = vld [vmem:[%s3489_s10 + $0x60] sm:$0xff]  ;;  %v2955_v35 = vld [vmem:[%s3489_s10 + $0x58] sm:$0xff] }
   0xa   :  { %v2962_v36 = vld [vmem:[%s3489_s10 + $0x50] sm:$0xff]  ;;  %v2969_v37 = vld [vmem:[%s3489_s10 + $0x48] sm:$0xff]  ;;  %v2976_v38 = vld [vmem:[%s3489_s10 + $0x40] sm:$0xff] }
   0xb   :  { %2360 = vmatpush3.bf16.msra.mxu0 %v2724_v5  ;;  %v2983_v39 = vld [vmem:[%s3489_s10 + $0x38] sm:$0xff]  ;;  %v2990_v40 = vld [vmem:[%s3489_s10 + $0x30] sm:$0xff]  ;;  %v2997_v41 = vld [vmem:[%s3489_s10 + $0x28] sm:$0xff] }
   0xc   :  { %2372 = vmatpush3.bf16.msra.mxu1 %v2725_v6  ;;  %2361 = vmatprep.subr.bf16.mxu0 %v2726_v7  ;;  %v3004_v42 = vld [vmem:[%s3489_s10 + $0x20] sm:$0xff]  ;;  %v3011_v43 = vld [vmem:[%s3489_s10 + $0x18] sm:$0xff]  ;;  %v3016_v44 = vld [vmem:[%s3489_s10 + $0x10] sm:$0xff] }
   0xd   :  { %2373 = vmatprep.subr.bf16.mxu1 %v2727_v8  ;;  %v67_v16 = vld [vmem:[#allocation2] sm:$0xff]  ;;  %v68_v17 = vld [vmem:[#allocation2 + $0x8] sm:$0xff] }
   0xe   :  { %v69_v18 = vld [vmem:[#allocation2 + $0x18] sm:$0xff]  ;;  %v71_v19 = vpack.c.bf16 %v68_v17, %v67_v16  ;;  %v70_v20 = vld [vmem:[#allocation2 + $0x20] sm:$0xff]  ;;  %v240_v22 = vld [vmem:[#allocation2 + $0xa] sm:$0xff] }
   0xf   :  { %2362 = vmatpush3.bf16.msra.mxu0 %v2726_v7  ;;  %v239_v21 = vld [vmem:[#allocation2 + $0x2] sm:$0xff]  ;;  %v72_v23 = vpack.c.bf16 %v70_v20, %v69_v18  ;;  %v241_v28 = vld [vmem:[#allocation2 + $0x1a] sm:$0xff] }
  0x10   :  { %2374 = vmatpush3.bf16.msra.mxu1 %v2727_v8  ;;  %2379 = vmatprep.subr.bf16.mxu0 %v2728_v14  ;;  %v243_v25 = vpack.c.bf16 %v240_v22, %v239_v21  ;;  %v242_v29 = vld [vmem:[#allocation2 + $0x22] sm:$0xff] }
  0x11   :  { %2391 = vmatprep.subr.mxu1 %v2783_v1  ;;  %2363 = vmatprep.mubr.msk.bf16.mxu0 %vm51_vm1, %v71_v19  ;;  %v244_v30 = vpack.c.bf16 %v242_v29, %v241_v28  ;;  %v3025_v45 = vld [vmem:[%s3489_s10 + $0x8] sm:$0xff]  ;;  %v3034_v46 = vld [vmem:[%s3489_s10] sm:$0xff]  ;;  %v508_v19 = vlaneseq }
  0x12   :  { %2364 = vmatmul.mubr.msk.bf16.vlgmr.msra.gmra.mxu0 %vm51_vm1, %v72_v23  ;;  %v3043_v47 = vld [vmem:[%s3490_s11] sm:$0xff] }
  0x13   :  { %2376 = vmatmul.mubr.msk.bf16.vlgmr.msra.gmra.mxu1 %vm51_vm1, %v2905_v15  ;;  %2380 = vmatpush3.bf16.msra.mxu0 %v2728_v14  ;;  %v509_v20 = vshrl.u32 %v508_v19, 7  ;;  %v2745_v19 = vld [vmem:[%s3491_s4 + $0x40] sm:$0xff]  }
  0x14   :  { %2387 = vmatprep.mubr.msk.bf16.mxu0 %vm51_vm1, %v243_v25  ;;  %2381 = vmatprep.subr.bf16.mxu0 %v2729_v24 }
  0x15   :  { %2392 = vmatpush3.msra.mxu1 %v2927_v31  ;;  %2423 = vmatprep.mubr.msk.f32.mxu1 %vm2784_vm2, %v2783_v1  ;;  %v3085_v21 = vsub.s32 0, %v509_v20  ;;  %v2746_v20 = vld [vmem:[%s3491_s4 + $0x8] sm:$0xff]  }
  0x16   :  { %2393 = vmatprep.subr.mxu1 %v2783_v1 }
  0x17   :  { %2382 = vmatpush3.bf16.msra.mxu0 %v2729_v24  ;;  %2394 = vmatpush3.msra.mxu1 %v2932_v32 }
  0x18   :  { %2383 = vmatprep.subr.bf16.mxu0 %v2730_v26  ;;  %2395 = vmatprep.subr.mxu1 %v2783_v1 }
  0x19   :  { %2396 = vmatpush3.msra.mxu1 %v2941_v33 }
  0x1a   :  { %2397 = vmatprep.subr.mxu1 %v2783_v1 }
  0x1b   :  { %2384 = vmatpush3.bf16.msra.mxu0 %v2730_v26  ;;  %2398 = vmatpush3.msra.mxu1 %v2948_v34 }
  0x1c   :  { %2385 = vmatprep.subr.bf16.mxu0 %v2731_v27  ;;  %2399 = vmatprep.subr.mxu1 %v2783_v1 }
  0x1d   :  { %2400 = vmatpush3.msra.mxu1 %v2955_v35 }
  0x1e   :  { %2401 = vmatprep.subr.mxu1 %v2783_v1 }
  0x1f   :  { %2386 = vmatpush3.bf16.msra.mxu0 %v2731_v27  ;;  %2402 = vmatpush3.msra.mxu1 %v2962_v36 }
  0x20   :  { %2426 = vmatprep.subr.mxu0 %v2783_v1  ;;  %2403 = vmatprep.subr.mxu1 %v2783_v1 }
  0x21   :  { %2404 = vmatpush3.msra.mxu1 %v2969_v37 }
  0x22   :  { %2388 = vmatmul.mubr.msk.bf16.vlgmr.msra.gmra.mxu0 %vm51_vm1, %v244_v30  ;;  %2405 = vmatprep.subr.mxu1 %v2783_v1 }
  0x23   :  { %2406 = vmatpush3.msra.mxu1 %v2976_v38  ;;  %2428 = vmatprep.mubr.msk.f32.mxu0 %vm2784_vm2, %v2783_v1 }
  0x24   :  { %2407 = vmatprep.subr.mxu1 %v2783_v1  ;;  %2427 = vmatpush3.msra.mxu0 %v3043_v47 }
  0x25   :  { %2408 = vmatpush3.msra.mxu1 %v2983_v39  ;;  %2431 = vmatprep.subr.mxu0 %v2783_v1 }
  0x26   :  { %2409 = vmatprep.subr.mxu1 %v2783_v1 }
  0x27   :  { %2410 = vmatpush3.msra.mxu1 %v2990_v40 }
  0x28   :  { %2411 = vmatprep.subr.mxu1 %v2783_v1 }
  0x29   :  { %2412 = vmatpush3.msra.mxu1 %v2997_v41 }
  0x2a   :  { %2413 = vmatprep.subr.mxu1 %v2783_v1 }
  0x2b   :  { %2414 = vmatpush3.msra.mxu1 %v3004_v42 }
  0x2c   :  { %2415 = vmatprep.subr.mxu1 %v2783_v1 }
  0x2d   :  { %2416 = vmatpush3.msra.mxu1 %v3011_v43 }
  0x2e   :  { %2417 = vmatprep.subr.mxu1 %v2783_v1 }
  0x2f   :  { %2418 = vmatpush3.msra.mxu1 %v3016_v44 }
  0x30   :  { %2419 = vmatprep.subr.mxu1 %v2783_v1 }
  0x31   :  { %2420 = vmatpush3.msra.mxu1 %v3025_v45 }
  0x32   :  { %2421 = vmatprep.subr.mxu1 %v2783_v1 }
  0x33   :  { %2422 = vmatpush3.msra.mxu1 %v3034_v46 }
  0x34   :  { %2466 = vmatprep.subr.mxu1 %v2783_v1 }
  0xd2   :  { %v2365_v48 = vpop.f32.mrf.mxu0 }
  0xd3   :  { %v2377_v49 = vpop.f32.mrf.mxu1 }
  0xd4   :  { %v145_v50 = vpop.f32.mrf.mxu0  ;;  %v233_v62 = vadd.f32 %v2377_v49, %v2365_v48 }
  0xd5   :  { %v224_v51 = vpop.f32.mrf.mxu1 }
  0xd6   :  { %v2366_v52 = vpop.f32.mrf.mxu0  ;;  %v225_v59 = vadd.f32 %v224_v51, %v145_v50 }
  0xd7   :  { %v2378_v53 = vpop.f32.mrf.mxu1 }
  0xd8   :  { %v148_v54 = vpop.f32.mrf.mxu0  ;;  %v236_v2 = vadd.f32 %v2378_v53, %v2366_v52 }
  0xd9   :  { %v227_v56 = vpop.f32.mrf.mxu1 }
  0xda   :  { %v228_v60 = vadd.f32 %v227_v56, %v148_v54 }
  0xe2   :  { %v2389_v55 = vpop.f32.mrf.mxu0 }
  0xe3   :  { %v335_v3 = vadd.f32 %v2389_v55, %v233_v62  ;;  %v2737_v62 = vld [vmem:[%s3491_s4 + $0x60] sm:$0xff]  }
  0xe4   :  { %v318_v57 = vpop.f32.mrf.mxu0 }
  0xe5   :  { %v333_v63 = vadd.f32 %v318_v57, %v225_v59  ;;  %v2732_v59 = vld [vmem:[%s3491_s4 + $0x78] sm:$0xff]  }
  0xe6   :  { %v2390_v58 = vpop.f32.mrf.mxu0 }
  0xe7   :  { %v336_v5 = vadd.f32 %v2390_v58, %v236_v2 }
  0xe8   :  { %v321_v61 = vpop.f32.mrf.mxu0 }
  0xe9   :  { %v334_v0 = vadd.f32 %v321_v61, %v228_v60  ;;  %v2733_v60 = vld [vmem:[%s3491_s4 + $0x70] sm:$0xff]   ;;  %v2735_v61 = vld [vmem:[%s3491_s4 + $0x68] sm:$0xff]  }
  0xeb   :  { %v337_v4 = vadd.f32 %v334_v0, %v333_v63 }
  0xed   :  { %v338_v6 = vadd.f32 %v337_v4, %v335_v3 }
  0xef   :  { %v339_v7 = vadd.f32 %v338_v6, %v336_v5 }
  0xf1   :  { %v340_v8 = vrot.slane %v339_v7, 4 }
  0xf3   :  { %v341_v9 = vadd.f32 %v340_v8, %v339_v7  ;;  %v2734_v8 = vld [vmem:[%s3491_s4 + $0x38] sm:$0xff]  }
  0xf5   :  { %v342_v10 = vrot.slane %v341_v9, 2 }
  0xf7   :  { %v343_v11 = vadd.f32 %v342_v10, %v341_v9  ;;  %v677_v9 = vld [vmem:[%s3493_s3] sm:$0x1]  ;;  %v2736_v10 = vld [vmem:[%s3491_s4 + $0x30] sm:$0xff]  }
  0xf9   :  { %v344_v13 = vrot.slane %v343_v11, 1 }
  0xfb   :  { %v345_v14 = vadd.f32 %v344_v13, %v343_v11  ;;  %v2738_v11 = vld [vmem:[%s3491_s4 + $0x28] sm:$0xff]   ;;  %v2740_v13 = vld [vmem:[%s3491_s4 + $0x20] sm:$0xff]  }
  0xfd   :  { %2424 = vmatmul.mubr.f32.vlgmr.msra.gmra.mxu1 %v345_v14  ;;  %v2741_v14 = vld [vmem:[%s3491_s4 + $0x50] sm:$0xff]  }
  0xfe   :  { %2467 = vmatpush3.msra.mxu1 %v3043_v47  ;;  %2468 = vmatprep.mubr.msk.f32.mxu1 %vm2784_vm2, %v2783_v1 }
  0xff   :  { %2471 = vmatprep.subr.mxu1 %v2783_v1 }
 0x1bd   :  { %v428_v16 = vpop.f32.mrf.mxu1 }
 0x1be   :  { %v432_v17 = vmul.f32 0.001953125, %v428_v16  ;;  %v2742_v16 = vld [vmem:[%s3491_s4 + $0x18] sm:$0xff]  }
 0x1bf   :  { %v2425_v18 = vpop.f32.mrf.mxu1 }
 0x1c0   :  { %2429 = vmatmul.mubr.msk.f32.vlgmr.msra.gmra.mxu0 %vm434_vm3, %v432_v17  ;;  %v2743_v17 = vld [vmem:[%s3491_s4 + $0x48] sm:$0xff]   ;;  %v2744_v18 = vld [vmem:[%s3491_s4 + $0x10] sm:$0xff]  }
 0x1c1   :  { %2432 = vmatpush3.msra.mxu0 %v2927_v31  ;;  %2463 = vmatprep.mubr.msk.f32.mxu0 %vm2784_vm2, %v2783_v1 }
 0x1c2   :  { %2433 = vmatprep.subr.mxu0 %v2783_v1 }
 0x1c3   :  { %2434 = vmatpush3.msra.mxu0 %v2932_v32 }
 0x1c4   :  { %2435 = vmatprep.subr.mxu0 %v2783_v1 }
 0x1c5   :  { %2436 = vmatpush3.msra.mxu0 %v2941_v33 }
 0x1c6   :  { %2437 = vmatprep.subr.mxu0 %v2783_v1 }
 0x1c7   :  { %2438 = vmatpush3.msra.mxu0 %v2948_v34 }
 0x1c8   :  { %2439 = vmatprep.subr.mxu0 %v2783_v1 }
 0x1c9   :  { %2440 = vmatpush3.msra.mxu0 %v2955_v35 }
 0x1ca   :  { %2441 = vmatprep.subr.mxu0 %v2783_v1 }
 0x1cb   :  { %2442 = vmatpush3.msra.mxu0 %v2962_v36 }
 0x1cc   :  { %2443 = vmatprep.subr.mxu0 %v2783_v1 }
 0x1cd   :  { %2444 = vmatpush3.msra.mxu0 %v2969_v37 }
 0x1ce   :  { %2445 = vmatprep.subr.mxu0 %v2783_v1 }
 0x1cf   :  { %2446 = vmatpush3.msra.mxu0 %v2976_v38 }
 0x1d0   :  { %2447 = vmatprep.subr.mxu0 %v2783_v1 }
 0x1d1   :  { %2448 = vmatpush3.msra.mxu0 %v2983_v39 }
 0x1d2   :  { %2449 = vmatprep.subr.mxu0 %v2783_v1 }
 0x1d3   :  { %2450 = vmatpush3.msra.mxu0 %v2990_v40 }
 0x1d4   :  { %2451 = vmatprep.subr.mxu0 %v2783_v1 }
 0x1d5   :  { %2452 = vmatpush3.msra.mxu0 %v2997_v41 }
 0x1d6   :  { %2453 = vmatprep.subr.mxu0 %v2783_v1 }
 0x1d7   :  { %2454 = vmatpush3.msra.mxu0 %v3004_v42 }
 0x1d8   :  { %2455 = vmatprep.subr.mxu0 %v2783_v1 }
 0x1d9   :  { %2456 = vmatpush3.msra.mxu0 %v3011_v43 }
 0x1da   :  { %2457 = vmatprep.subr.mxu0 %v2783_v1 }
 0x1db   :  { %2458 = vmatpush3.msra.mxu0 %v3016_v44 }
 0x1dc   :  { %2459 = vmatprep.subr.mxu0 %v2783_v1 }
 0x1dd   :  { %2460 = vmatpush3.msra.mxu0 %v3025_v45 }
 0x1de   :  { %2461 = vmatprep.subr.mxu0 %v2783_v1 }
 0x1df   :  { %2462 = vmatpush3.msra.mxu0 %v3034_v46 }
 0x1e0   :  { %2496 = vmatprep.subr.bf16.mxu0 %v2732_v59 }
 0x280   :  { %v504_v22 = vpop.f32.mrf.mxu0 }
 0x281   :  { %v511_v23 = vrot.slane %v504_v22, %v3085_v21  ;;  %v2747_v22 = vld [vmem:[%s3491_s4] sm:$0xff]  }
 0x282   :  { %v2430_v24 = vpop.f32.mrf.mxu0 }
 0x283   :  { %v3088_v25 = vsub.f32 %v333_v63, %v511_v23  ;;  %v3090_v26 = vsub.f32 %v334_v0, %v511_v23  ;;  %v3092_v27 = vsub.f32 %v335_v3, %v511_v23  ;;  %v3094_v28 = vsub.f32 %v336_v5, %v511_v23  ;;  %v2739_v63 = vld [vmem:[%s3491_s4 + $0x58] sm:$0xff]   ;;  %v600_v5 = vld [vmem:[%s3492_s2] sm:$0x1] }
 0x284   :  { %v2748_v23 = vld [vmem:[%s3491_s4 + $0xb8] sm:$0xff]  }
 0x285   :  { %v516_v29 = vmul.f32 %v3088_v25, %v3088_v25  ;;  %v517_v30 = vmul.f32 %v3090_v26, %v3090_v26  ;;  %v518_v48 = vmul.f32 %v3092_v27, %v3092_v27  ;;  %v519_v50 = vmul.f32 %v3094_v28, %v3094_v28 }
 0x287   :  { %v520_v49 = vadd.f32 %v517_v30, %v516_v29 }
 0x289   :  { %v521_v51 = vadd.f32 %v520_v49, %v518_v48 }
 0x28b   :  { %v522_v52 = vadd.f32 %v521_v51, %v519_v50 }
 0x28d   :  { %v523_v53 = vrot.slane %v522_v52, 4 }
 0x28f   :  { %v524_v54 = vadd.f32 %v523_v53, %v522_v52 }
 0x291   :  { %v525_v55 = vrot.slane %v524_v54, 2 }
 0x293   :  { %v526_v56 = vadd.f32 %v525_v55, %v524_v54 }
 0x295   :  { %v527_v57 = vrot.slane %v526_v56, 1 }
 0x297   :  { %v528_v58 = vadd.f32 %v527_v57, %v526_v56 }
 0x299   :  { %2464 = vmatmul.mubr.f32.vlgmr.msra.gmra.mxu0 %v528_v58 }
 0x29a   :  { %2497 = vmatpush3.bf16.msra.mxu0 %v2732_v59 }
 0x29b   :  { %2498 = vmatprep.subr.bf16.mxu0 %v2733_v60 }
 0x29e   :  { %2499 = vmatpush3.bf16.msra.mxu0 %v2733_v60 }
 0x29f   :  { %2500 = vmatprep.subr.bf16.mxu0 %v2735_v61 }
 0x2a2   :  { %2501 = vmatpush3.bf16.msra.mxu0 %v2735_v61 }
 0x2a3   :  { %2502 = vmatprep.subr.bf16.mxu0 %v2737_v62 }
 0x2a6   :  { %2503 = vmatpush3.bf16.msra.mxu0 %v2737_v62 }
 0x2a7   :  { %2504 = vmatprep.subr.bf16.mxu0 %v2739_v63 }
 0x2aa   :  { %2505 = vmatpush3.bf16.msra.mxu0 %v2739_v63 }
 0x2ab   :  { %2506 = vmatprep.subr.bf16.mxu0 %v2741_v14 }
 0x2ae   :  { %2507 = vmatpush3.bf16.msra.mxu0 %v2741_v14  ;;  %v2755_v14 = vld [vmem:[%s3491_s4 + $0x80] sm:$0xff]  }
 0x2af   :  { %2508 = vmatprep.subr.bf16.mxu0 %v2743_v17 }
 0x2b2   :  { %2509 = vmatpush3.bf16.msra.mxu0 %v2743_v17 }
 0x2b3   :  { %2510 = vmatprep.subr.bf16.mxu0 %v2745_v19 }
 0x2b6   :  { %2511 = vmatpush3.bf16.msra.mxu0 %v2745_v19 }
 0x2b7   :  { %2536 = vmatprep.subr.mxu0 %v2783_v1 }
 0x359   :  { %v595_v0 = vpop.f32.mrf.mxu0 }
 0x35a   :  { %v599_v2 = vmul.f32 0.001953125, %v595_v0 }
 0x35b   :  { %v2465_v3 = vpop.f32.mrf.mxu0 }
 0x35c   :  { %v601_v4 = vadd.f32 1e-05, %v599_v2 }
 0x35e   :  { %2760 = vrsqrt.f32 %v601_v4 }
 0x36b   :  { %v2761_v6 = vpop.eup %2760 }
 0x36c   :  { %v603_v7 = vmul.f32 %v2761_v6, %v600_v5  ;;  %v2749_v6 = vld [vmem:[%s3491_s4 + $0xb0] sm:$0xff]  }
 0x36e   :  { %2469 = vmatmul.mubr.msk.f32.vlgmr.msra.gmra.mxu1 %vm434_vm3, %v603_v7 }
 0x36f   :  { %2472 = vmatpush3.msra.mxu1 %v3043_v47  ;;  %2473 = vmatprep.mubr.msk.f32.mxu1 %vm2784_vm2, %v2783_v1 }
 0x370   :  { %2476 = vmatprep.subr.bf16.mxu1 %v2734_v8 }
 0x372   :  { %2474 = vmatmul.mubr.msk.f32.vlgmr.msra.gmra.mxu1 %vm434_vm3, %v677_v9  ;;  %v2751_v9 = vld [vmem:[%s3491_s4 + $0xa0] sm:$0xff]  }
 0x373   :  { %2477 = vmatpush3.bf16.msra.mxu1 %v2734_v8  ;;  %v2750_v8 = vld [vmem:[%s3491_s4 + $0xa8] sm:$0xff]  }
 0x374   :  { %2478 = vmatprep.subr.bf16.mxu1 %v2736_v10 }
 0x377   :  { %2479 = vmatpush3.bf16.msra.mxu1 %v2736_v10  ;;  %v2752_v10 = vld [vmem:[%s3491_s4 + $0x98] sm:$0xff]  }
 0x378   :  { %2480 = vmatprep.subr.bf16.mxu1 %v2738_v11 }
 0x37b   :  { %2481 = vmatpush3.bf16.msra.mxu1 %v2738_v11  ;;  %v2753_v11 = vld [vmem:[%s3491_s4 + $0x90] sm:$0xff]  }
 0x37c   :  { %2482 = vmatprep.subr.bf16.mxu1 %v2740_v13 }
 0x37f   :  { %2483 = vmatpush3.bf16.msra.mxu1 %v2740_v13  ;;  %v2754_v13 = vld [vmem:[%s3491_s4 + $0x88] sm:$0xff]  }
 0x380   :  { %2484 = vmatprep.subr.bf16.mxu1 %v2742_v16 }
 0x383   :  { %2485 = vmatpush3.bf16.msra.mxu1 %v2742_v16 }
 0x384   :  { %2486 = vmatprep.subr.bf16.mxu1 %v2744_v18 }
 0x387   :  { %2487 = vmatpush3.bf16.msra.mxu1 %v2744_v18 }
 0x388   :  { %2488 = vmatprep.subr.bf16.mxu1 %v2746_v20 }
 0x38b   :  { %2489 = vmatpush3.bf16.msra.mxu1 %v2746_v20 }
 0x38c   :  { %2490 = vmatprep.subr.bf16.mxu1 %v2747_v22 }
 0x38f   :  { %2491 = vmatpush3.bf16.msra.mxu1 %v2747_v22 }
 0x390   :  { %2516 = vmatprep.subr.bf16.mxu1 %v2748_v23 }
 0x42e   :  { %v673_v24 = vpop.f32.mrf.mxu1 }
 0x42f   :  { %v754_v29 = vrot.slane %v673_v24, %v3085_v21 }
 0x430   :  { %v2470_v30 = vpop.f32.mrf.mxu1 }
 0x431   :  { %v757_v48 = vmul.f32 %v754_v29, %v3092_v27  ;;  %v758_v50 = vmul.f32 %v754_v29, %v3094_v28  ;;  %v755_v52 = vmul.f32 %v754_v29, %v3088_v25  ;;  %v756_v53 = vmul.f32 %v754_v29, %v3090_v26 }
 0x432   :  { %v747_v49 = vpop.f32.mrf.mxu1 }
 0x433   :  { %v762_v51 = vrot.slane %v747_v49, %v3085_v21 }
 0x434   :  { %v2475_v54 = vpop.f32.mrf.mxu1 }
 0x435   :  { %v765_v55 = vadd.f32 %v762_v51, %v757_v48  ;;  %v766_v56 = vadd.f32 %v762_v51, %v758_v50  ;;  %v763_v57 = vadd.f32 %v762_v51, %v755_v52  ;;  %v764_v58 = vadd.f32 %v762_v51, %v756_v53 }
 0x437   :  { %v769_v59 = vmax.f32 %v765_v55, 0.0  ;;  %v770_v60 = vmax.f32 %v766_v56, 0.0  ;;  %v767_v61 = vmax.f32 %v763_v57, 0.0  ;;  %v768_v62 = vmax.f32 %v764_v58, 0.0 }
 0x439   :  { %777 = vst [vmem:[#allocation3 + $0x19] sm:$0xff] %v769_v59  ;;  %778 = vst [vmem:[#allocation3 + $0x21] sm:$0xff] %v770_v60  ;;  %v779_v27 = vpack.c.bf16 %v768_v62, %v767_v61  ;;  %v780_v28 = vpack.c.bf16 %v770_v60, %v769_v59 }
 0x43a   :  { %775 = vst [vmem:[#allocation3 + $0x1] sm:$0xff] %v767_v61  ;;  %776 = vst [vmem:[#allocation3 + $0x9] sm:$0xff] %v768_v62 }
 0x43b   :  { %2512 = vmatprep.mubr.bf16.mxu0 %v779_v27 }
 0x43c   :  { %2513 = vmatmul.mubr.bf16.vlgmr.msra.gmra.mxu0 %v780_v28 }
 0x43d   :  { %2537 = vmatpush3.msra.mxu0 %v2927_v31  ;;  %2568 = vmatprep.mubr.msk.f32.mxu0 %vm2784_vm2, %v2783_v1 }
 0x43e   :  { %2538 = vmatprep.subr.mxu0 %v2783_v1 }
 0x43f   :  { %2539 = vmatpush3.msra.mxu0 %v2932_v32 }
 0x440   :  { %v800_v63 = vld [vmem:[#allocation3 + $0x18] sm:$0xff]  ;;  %2540 = vmatprep.subr.mxu0 %v2783_v1  ;;  %v801_v2 = vld [vmem:[#allocation3 + $0x20] sm:$0xff] }
 0x441   :  { %v798_v25 = vld [vmem:[#allocation3] sm:$0xff]  ;;  %v799_v26 = vld [vmem:[#allocation3 + $0x8] sm:$0xff]  ;;  %2541 = vmatpush3.msra.mxu0 %v2941_v33  ;;  %v803_v5 = vpack.c.bf16 %v801_v2, %v800_v63 }
 0x442   :  { %v802_v0 = vpack.c.bf16 %v799_v26, %v798_v25  ;;  %v1014_v3 = vld [vmem:[#allocation3 + $0x2] sm:$0xff]  ;;  %v1015_v4 = vld [vmem:[#allocation3 + $0xa] sm:$0xff]  ;;  %2542 = vmatprep.subr.mxu0 %v2783_v1  ;;  %v1016_v16 = vld [vmem:[#allocation3 + $0x1a] sm:$0xff] }
 0x443   :  { %v1018_v7 = vpack.c.bf16 %v1015_v4, %v1014_v3  ;;  %2543 = vmatpush3.msra.mxu0 %v2948_v34  ;;  %v1017_v17 = vld [vmem:[#allocation3 + $0x22] sm:$0xff] }
 0x444   :  { %2492 = vmatprep.mubr.bf16.mxu1 %v802_v0  ;;  %2544 = vmatprep.subr.mxu0 %v2783_v1  ;;  %v1019_v18 = vpack.c.bf16 %v1017_v17, %v1016_v16 }
 0x445   :  { %2493 = vmatmul.mubr.bf16.vlgmr.msra.gmra.mxu1 %v803_v5  ;;  %2545 = vmatpush3.msra.mxu0 %v2955_v35 }
 0x446   :  { %2517 = vmatpush3.bf16.msra.mxu1 %v2748_v23  ;;  %2532 = vmatprep.mubr.bf16.mxu1 %v1018_v7 }
 0x447   :  { %2518 = vmatprep.subr.bf16.mxu1 %v2749_v6  ;;  %2546 = vmatprep.subr.mxu0 %v2783_v1 }
 0x448   :  { %2547 = vmatpush3.msra.mxu0 %v2962_v36 }
 0x449   :  { %2548 = vmatprep.subr.mxu0 %v2783_v1 }
 0x44a   :  { %2519 = vmatpush3.bf16.msra.mxu1 %v2749_v6  ;;  %2549 = vmatpush3.msra.mxu0 %v2969_v37 }
 0x44b   :  { %2520 = vmatprep.subr.bf16.mxu1 %v2750_v8  ;;  %2550 = vmatprep.subr.mxu0 %v2783_v1 }
 0x44c   :  { %2551 = vmatpush3.msra.mxu0 %v2976_v38 }
 0x44d   :  { %2552 = vmatprep.subr.mxu0 %v2783_v1 }
 0x44e   :  { %2521 = vmatpush3.bf16.msra.mxu1 %v2750_v8  ;;  %2553 = vmatpush3.msra.mxu0 %v2983_v39 }
 0x44f   :  { %2522 = vmatprep.subr.bf16.mxu1 %v2751_v9  ;;  %2554 = vmatprep.subr.mxu0 %v2783_v1 }
 0x450   :  { %2555 = vmatpush3.msra.mxu0 %v2990_v40 }
 0x451   :  { %2556 = vmatprep.subr.mxu0 %v2783_v1 }
 0x452   :  { %2523 = vmatpush3.bf16.msra.mxu1 %v2751_v9  ;;  %2557 = vmatpush3.msra.mxu0 %v2997_v41 }
 0x453   :  { %2524 = vmatprep.subr.bf16.mxu1 %v2752_v10  ;;  %2558 = vmatprep.subr.mxu0 %v2783_v1 }
 0x454   :  { %2559 = vmatpush3.msra.mxu0 %v3004_v42 }
 0x455   :  { %2560 = vmatprep.subr.mxu0 %v2783_v1 }
 0x456   :  { %2525 = vmatpush3.bf16.msra.mxu1 %v2752_v10  ;;  %2561 = vmatpush3.msra.mxu0 %v3011_v43 }
 0x457   :  { %2526 = vmatprep.subr.bf16.mxu1 %v2753_v11  ;;  %2562 = vmatprep.subr.mxu0 %v2783_v1 }
 0x458   :  { %2563 = vmatpush3.msra.mxu0 %v3016_v44 }
 0x459   :  { %2564 = vmatprep.subr.mxu0 %v2783_v1 }
 0x45a   :  { %2527 = vmatpush3.bf16.msra.mxu1 %v2753_v11  ;;  %2565 = vmatpush3.msra.mxu0 %v3025_v45 }
 0x45b   :  { %2528 = vmatprep.subr.bf16.mxu1 %v2754_v13  ;;  %2566 = vmatprep.subr.mxu0 %v2783_v1 }
 0x45c   :  { %2567 = vmatpush3.msra.mxu0 %v3034_v46 }
 0x45d   :  { %2611 = vmatprep.subr.mxu0 %v2783_v1 }
 0x45e   :  { %2529 = vmatpush3.bf16.msra.mxu1 %v2754_v13 }
 0x45f   :  { %2530 = vmatprep.subr.bf16.mxu1 %v2755_v14 }
 0x462   :  { %2531 = vmatpush3.bf16.msra.mxu1 %v2755_v14 }
 0x463   :  { %2571 = vmatprep.subr.mxu1 %v2783_v1 }
 0x465   :  { %2533 = vmatmul.mubr.bf16.vlgmr.msra.gmra.mxu1 %v1019_v18 }
 0x466   :  { %2572 = vmatpush3.msra.mxu1 %v3043_v47  ;;  %2573 = vmatprep.mubr.msk.f32.mxu1 %vm2784_vm2, %v2783_v1 }
 0x467   :  { %2576 = vmatprep.subr.mxu1 %v2783_v1 }
 0x4fc   :  { %v2514_v22 = vpop.f32.mrf.mxu0 }
 0x4fe   :  { %v999_v24 = vpop.f32.mrf.mxu0 }
 0x500   :  { %v2515_v30 = vpop.f32.mrf.mxu0 }
 0x502   :  { %v1002_v50 = vpop.f32.mrf.mxu0 }
 0x505   :  { %v2494_v19 = vpop.f32.mrf.mxu1 }
 0x506   :  { %v1008_v55 = vadd.f32 %v2514_v22, %v2494_v19 }
 0x507   :  { %v902_v20 = vpop.f32.mrf.mxu1 }
 0x508   :  { %v1000_v52 = vadd.f32 %v999_v24, %v902_v20 }
 0x509   :  { %v2495_v23 = vpop.f32.mrf.mxu1 }
 0x50a   :  { %v1011_v58 = vadd.f32 %v2515_v30, %v2495_v23 }
 0x50b   :  { %v905_v29 = vpop.f32.mrf.mxu1 }
 0x50c   :  { %v1003_v53 = vadd.f32 %v1002_v50, %v905_v29 }
 0x525   :  { %v2534_v48 = vpop.f32.mrf.mxu1 }
 0x526   :  { %v1136_v59 = vadd.f32 %v2534_v48, %v1008_v55 }
 0x527   :  { %v1119_v49 = vpop.f32.mrf.mxu1 }
 0x528   :  { %v1134_v56 = vadd.f32 %v1119_v49, %v1000_v52 }
 0x529   :  { %v2535_v51 = vpop.f32.mrf.mxu1 }
 0x52a   :  { %v1137_v61 = vadd.f32 %v2535_v51, %v1011_v58  ;;  %v1477_v58 = vld [vmem:[%s3496_s6] sm:$0x1] }
 0x52b   :  { %v1122_v54 = vpop.f32.mrf.mxu1 }
 0x52c   :  { %v1135_v57 = vadd.f32 %v1122_v54, %v1003_v53  ;;  %v1400_v54 = vld [vmem:[%s3495_s5] sm:$0x1] }
 0x52e   :  { %v1138_v60 = vadd.f32 %v1135_v57, %v1134_v56 }
 0x530   :  { %v1139_v62 = vadd.f32 %v1138_v60, %v1136_v59  ;;  %v2758_v60 = vld [vmem:[%s3494_s7 + $0x8] sm:$0xff]  }
 0x532   :  { %v1140_v27 = vadd.f32 %v1139_v62, %v1137_v61 }
 0x534   :  { %v1141_v28 = vrot.slane %v1140_v27, 4 }
 0x536   :  { %v1142_v25 = vadd.f32 %v1141_v28, %v1140_v27 }
 0x538   :  { %v1143_v26 = vrot.slane %v1142_v25, 2 }
 0x53a   :  { %v1144_v63 = vadd.f32 %v1143_v26, %v1142_v25 }
 0x53c   :  { %v1145_v0 = vrot.slane %v1144_v63, 1 }
 0x53e   :  { %v1146_v2 = vadd.f32 %v1145_v0, %v1144_v63 }
 0x540   :  { %2569 = vmatmul.mubr.f32.vlgmr.msra.gmra.mxu0 %v1146_v2 }
 0x541   :  { %2612 = vmatpush3.msra.mxu0 %v3043_v47  ;;  %2613 = vmatprep.mubr.msk.f32.mxu0 %vm2784_vm2, %v2783_v1 }
 0x542   :  { %2616 = vmatprep.subr.mxu0 %v2783_v1 }
 0x600   :  { %v1229_v3 = vpop.f32.mrf.mxu0 }
 0x601   :  { %v1233_v4 = vmul.f32 0.001953125, %v1229_v3 }
 0x602   :  { %v2570_v5 = vpop.f32.mrf.mxu0 }
 0x603   :  { %2574 = vmatmul.mubr.msk.f32.vlgmr.msra.gmra.mxu1 %vm434_vm3, %v1233_v4 }
 0x604   :  { %2577 = vmatpush3.msra.mxu1 %v2927_v31  ;;  %2608 = vmatprep.mubr.msk.f32.mxu1 %vm2784_vm2, %v2783_v1 }
 0x605   :  { %2578 = vmatprep.subr.mxu1 %v2783_v1 }
 0x606   :  { %2579 = vmatpush3.msra.mxu1 %v2932_v32 }
 0x607   :  { %2580 = vmatprep.subr.mxu1 %v2783_v1 }
 0x608   :  { %2581 = vmatpush3.msra.mxu1 %v2941_v33 }
 0x609   :  { %2582 = vmatprep.subr.mxu1 %v2783_v1 }
 0x60a   :  { %2583 = vmatpush3.msra.mxu1 %v2948_v34 }
 0x60b   :  { %2584 = vmatprep.subr.mxu1 %v2783_v1 }
 0x60c   :  { %2585 = vmatpush3.msra.mxu1 %v2955_v35 }
 0x60d   :  { %2586 = vmatprep.subr.mxu1 %v2783_v1 }
 0x60e   :  { %2587 = vmatpush3.msra.mxu1 %v2962_v36 }
 0x60f   :  { %2588 = vmatprep.subr.mxu1 %v2783_v1 }
 0x610   :  { %2589 = vmatpush3.msra.mxu1 %v2969_v37 }
 0x611   :  { %2590 = vmatprep.subr.mxu1 %v2783_v1 }
 0x612   :  { %2591 = vmatpush3.msra.mxu1 %v2976_v38 }
 0x613   :  { %2592 = vmatprep.subr.mxu1 %v2783_v1 }
 0x614   :  { %2593 = vmatpush3.msra.mxu1 %v2983_v39 }
 0x615   :  { %2594 = vmatprep.subr.mxu1 %v2783_v1 }
 0x616   :  { %2595 = vmatpush3.msra.mxu1 %v2990_v40 }
 0x617   :  { %2596 = vmatprep.subr.mxu1 %v2783_v1 }
 0x618   :  { %2597 = vmatpush3.msra.mxu1 %v2997_v41 }
 0x619   :  { %2598 = vmatprep.subr.mxu1 %v2783_v1 }
 0x61a   :  { %2599 = vmatpush3.msra.mxu1 %v3004_v42 }
 0x61b   :  { %2600 = vmatprep.subr.mxu1 %v2783_v1 }
 0x61c   :  { %2601 = vmatpush3.msra.mxu1 %v3011_v43 }
 0x61d   :  { %2602 = vmatprep.subr.mxu1 %v2783_v1 }
 0x61e   :  { %2603 = vmatpush3.msra.mxu1 %v3016_v44 }
 0x61f   :  { %2604 = vmatprep.subr.mxu1 %v2783_v1 }
 0x620   :  { %2605 = vmatpush3.msra.mxu1 %v3025_v45 }
 0x621   :  { %2606 = vmatprep.subr.mxu1 %v2783_v1 }
 0x622   :  { %2607 = vmatpush3.msra.mxu1 %v3034_v46 }
 0x623   :  { %2668 = vmatprep.subr.mxu1 %v2783_v1 }
 0x6c3   :  { %v1304_v6 = vpop.f32.mrf.mxu1 }
 0x6c4   :  { %v1311_v7 = vrot.slane %v1304_v6, %v3085_v21 }
 0x6c5   :  { %v2575_v8 = vpop.f32.mrf.mxu1 }
 0x6c6   :  { %v3273_v9 = vsub.f32 %v1134_v56, %v1311_v7  ;;  %v3275_v10 = vsub.f32 %v1135_v57, %v1311_v7  ;;  %v3277_v11 = vsub.f32 %v1136_v59, %v1311_v7  ;;  %v3279_v13 = vsub.f32 %v1137_v61, %v1311_v7  ;;  %v2756_v57 = vld [vmem:[%s3494_s7 + $0x18] sm:$0xff]   ;;  %v2757_v59 = vld [vmem:[%s3494_s7 + $0x10] sm:$0xff]   ;;  %v2759_v61 = vld [vmem:[%s3494_s7] sm:$0xff]  }
 0x6c7   :  { %v2766_v7 = vld [vmem:[%s3489_s10 + $0x78] sm:$0xff]  ;;  %v2768_v8 = vld [vmem:[%s3489_s10 + $0x68] sm:$0xff] }
 0x6c8   :  { %v1316_v14 = vmul.f32 %v3273_v9, %v3273_v9  ;;  %v1317_v16 = vmul.f32 %v3275_v10, %v3275_v10  ;;  %v1318_v17 = vmul.f32 %v3277_v11, %v3277_v11  ;;  %v1319_v19 = vmul.f32 %v3279_v13, %v3279_v13 }
 0x6ca   :  { %v1320_v18 = vadd.f32 %v1317_v16, %v1316_v14  ;;  %v2773_v14 = vld [vmem:[%s3489_s10 + $0x40] sm:$0xff]  ;;  %v2774_v16 = vld [vmem:[%s3489_s10 + $0x38] sm:$0xff] }
 0x6cc   :  { %v1321_v20 = vadd.f32 %v1320_v18, %v1318_v17  ;;  %v2775_v17 = vld [vmem:[%s3489_s10 + $0x30] sm:$0xff]  ;;  %v2776_v18 = vld [vmem:[%s3489_s10 + $0x28] sm:$0xff] }
 0x6ce   :  { %v1322_v22 = vadd.f32 %v1321_v20, %v1319_v19  ;;  %v2777_v19 = vld [vmem:[%s3489_s10 + $0x20] sm:$0xff]  ;;  %v2778_v20 = vld [vmem:[%s3489_s10 + $0x18] sm:$0xff] }
 0x6d0   :  { %v1323_v23 = vrot.slane %v1322_v22, 4 }
 0x6d2   :  { %v1324_v24 = vadd.f32 %v1323_v23, %v1322_v22  ;;  %v2779_v22 = vld [vmem:[%s3489_s10 + $0x10] sm:$0xff]  ;;  %v2780_v23 = vld [vmem:[%s3489_s10 + $0x8] sm:$0xff] }
 0x6d4   :  { %v1325_v29 = vrot.slane %v1324_v24, 2 }
 0x6d6   :  { %v1326_v30 = vadd.f32 %v1325_v29, %v1324_v24  ;;  %v2781_v24 = vld [vmem:[%s3489_s10] sm:$0xff] }
 0x6d8   :  { %v1327_v48 = vrot.slane %v1326_v30, 1 }
 0x6da   :  { %v1328_v49 = vadd.f32 %v1327_v48, %v1326_v30 }
 0x6dc   :  { %2609 = vmatmul.mubr.f32.vlgmr.msra.gmra.mxu1 %v1328_v49 }
 0x6dd   :  { %2669 = vmatpush3.msra.mxu1 %v3043_v47  ;;  %2670 = vmatprep.mubr.msk.f32.mxu1 %vm2784_vm2, %v2783_v1 }
 0x6de   :  { %2673 = vmatprep.subr.mxu1 %v2783_v1 }
 0x79c   :  { %v1395_v50 = vpop.f32.mrf.mxu1 }
 0x79d   :  { %v1399_v51 = vmul.f32 0.001953125, %v1395_v50 }
 0x79e   :  { %v2610_v52 = vpop.f32.mrf.mxu1 }
 0x79f   :  { %v1401_v53 = vadd.f32 1e-05, %v1399_v51 }
 0x7a1   :  { %2762 = vrsqrt.f32 %v1401_v53 }
 0x7ae   :  { %v2763_v55 = vpop.eup %2762 }
 0x7af   :  { %v1403_v56 = vmul.f32 %v2763_v55, %v1400_v54 }
 0x7b1   :  { %2614 = vmatmul.mubr.msk.f32.vlgmr.msra.gmra.mxu0 %vm434_vm3, %v1403_v56 }
 0x7b2   :  { %2617 = vmatpush3.msra.mxu0 %v3043_v47  ;;  %2618 = vmatprep.mubr.msk.f32.mxu0 %vm2784_vm2, %v2783_v1 }
 0x7b3   :  { %2621 = vmatprep.subr.bf16.mxu0 %v2756_v57 }
 0x7b5   :  { %2619 = vmatmul.mubr.msk.f32.vlgmr.msra.gmra.mxu0 %vm434_vm3, %v1477_v58 }
 0x7b6   :  { %2622 = vmatpush3.bf16.msra.mxu0 %v2756_v57  ;;  %2629 = vmatprep.mubr.msk.bf16.mxu0 %vm51_vm1, %v2893_v12 }
 0x7b7   :  { %2623 = vmatprep.subr.bf16.mxu0 %v2757_v59 }
 0x7ba   :  { %2624 = vmatpush3.bf16.msra.mxu0 %v2757_v59 }
 0x7bb   :  { %2625 = vmatprep.subr.bf16.mxu0 %v2758_v60 }
 0x7be   :  { %2626 = vmatpush3.bf16.msra.mxu0 %v2758_v60 }
 0x7bf   :  { %2627 = vmatprep.subr.bf16.mxu0 %v2759_v61 }
 0x7c2   :  { %2628 = vmatpush3.bf16.msra.mxu0 %v2759_v61 }
 0x7c3   :  { %2633 = vmatprep.subr.mxu0 %v2783_v1 }
 0x7c5   :  { %2630 = vmatmul.mubr.msk.bf16.vlgmr.msra.gmra.mxu0 %vm51_vm1, %v2905_v15 }
 0x7c6   :  { %2634 = vmatpush3.msra.mxu0 %v2927_v31  ;;  %2665 = vmatprep.mubr.msk.f32.mxu0 %vm2784_vm2, %v2783_v1 }
 0x7c7   :  { %2635 = vmatprep.subr.mxu0 %v2783_v1 }
 0x7c8   :  { %2636 = vmatpush3.msra.mxu0 %v2932_v32 }
 0x7c9   :  { %2637 = vmatprep.subr.mxu0 %v2783_v1 }
 0x7ca   :  { %2638 = vmatpush3.msra.mxu0 %v2941_v33 }
 0x7cb   :  { %2639 = vmatprep.subr.mxu0 %v2783_v1 }
 0x7cc   :  { %2640 = vmatpush3.msra.mxu0 %v2948_v34 }
 0x7cd   :  { %2641 = vmatprep.subr.mxu0 %v2783_v1 }
 0x7ce   :  { %2642 = vmatpush3.msra.mxu0 %v2955_v35 }
 0x7cf   :  { %2643 = vmatprep.subr.mxu0 %v2783_v1 }
 0x7d0   :  { %2644 = vmatpush3.msra.mxu0 %v2962_v36 }
 0x7d1   :  { %2645 = vmatprep.subr.mxu0 %v2783_v1 }
 0x7d2   :  { %2646 = vmatpush3.msra.mxu0 %v2969_v37 }
 0x7d3   :  { %2647 = vmatprep.subr.mxu0 %v2783_v1 }
 0x7d4   :  { %2648 = vmatpush3.msra.mxu0 %v2976_v38 }
 0x7d5   :  { %2649 = vmatprep.subr.mxu0 %v2783_v1 }
 0x7d6   :  { %2650 = vmatpush3.msra.mxu0 %v2983_v39 }
 0x7d7   :  { %2651 = vmatprep.subr.mxu0 %v2783_v1 }
 0x7d8   :  { %2652 = vmatpush3.msra.mxu0 %v2990_v40 }
 0x7d9   :  { %2653 = vmatprep.subr.mxu0 %v2783_v1 }
 0x7da   :  { %2654 = vmatpush3.msra.mxu0 %v2997_v41 }
 0x7db   :  { %2655 = vmatprep.subr.mxu0 %v2783_v1 }
 0x7dc   :  { %2656 = vmatpush3.msra.mxu0 %v3004_v42 }
 0x7dd   :  { %2657 = vmatprep.subr.mxu0 %v2783_v1 }
 0x7de   :  { %2658 = vmatpush3.msra.mxu0 %v3011_v43 }
 0x7df   :  { %2659 = vmatprep.subr.mxu0 %v2783_v1 }
 0x7e0   :  { %2660 = vmatpush3.msra.mxu0 %v3016_v44 }
 0x7e1   :  { %2661 = vmatprep.subr.mxu0 %v2783_v1 }
 0x7e2   :  { %2662 = vmatpush3.msra.mxu0 %v3025_v45 }
 0x7e3   :  { %2663 = vmatprep.subr.mxu0 %v2783_v1 }
 0x7e4   :  { %2664 = vmatpush3.msra.mxu0 %v3034_v46 }
 0x7e5   :  { %2708 = vmatprep.subr.mxu0 %v2783_v1 }
 0x871   :  { %v1473_v12 = vpop.f32.mrf.mxu0 }
 0x872   :  { %v1554_v15 = vrot.slane %v1473_v12, %v3085_v21 }
 0x873   :  { %v2615_v31 = vpop.f32.mrf.mxu0 }
 0x874   :  { %v1555_v32 = vmul.f32 %v1554_v15, %v3273_v9  ;;  %v1556_v34 = vmul.f32 %v1554_v15, %v3275_v10  ;;  %v1557_v35 = vmul.f32 %v1554_v15, %v3277_v11  ;;  %v1558_v36 = vmul.f32 %v1554_v15, %v3279_v13  ;;  %v2769_v9 = vld [vmem:[%s3489_s10 + $0x60] sm:$0xff]  ;;  %v2770_v10 = vld [vmem:[%s3489_s10 + $0x58] sm:$0xff]  ;;  %v2771_v11 = vld [vmem:[%s3489_s10 + $0x50] sm:$0xff] }
 0x875   :  { %v1547_v33 = vpop.f32.mrf.mxu0  ;;  %v2772_v13 = vld [vmem:[%s3489_s10 + $0x48] sm:$0xff] }
 0x876   :  { %v1562_v37 = vrot.slane %v1547_v33, %v3085_v21 }
 0x877   :  { %v2620_v38 = vpop.f32.mrf.mxu0 }
 0x878   :  { %v3361_v39 = vadd.f32 %v1562_v37, %v1555_v32  ;;  %v3363_v40 = vadd.f32 %v1562_v37, %v1556_v34  ;;  %v3365_v41 = vadd.f32 %v1562_v37, %v1557_v35  ;;  %v3367_v42 = vadd.f32 %v1562_v37, %v1558_v36  ;;  %v1893_v37 = vld [vmem:[%s3497_s8] sm:$0x1] }
 0x885   :  { %v3369_v43 = vpop.f32.mrf.mxu0 }
 0x887   :  { %v3371_v44 = vpop.f32.mrf.mxu0 }
 0x889   :  { %v3373_v45 = vpop.f32.mrf.mxu0 }
 0x88b   :  { %v3375_v46 = vpop.f32.mrf.mxu0 }
 0x88c   :  { %v1648_v62 = vadd.f32 %v3375_v46, %v3371_v44 }
 0x88e   :  { %v1649_v27 = vadd.f32 %v3369_v43, %v1648_v62 }
 0x890   :  { %v1650_v28 = vadd.f32 %v3373_v45, %v1649_v27 }
 0x892   :  { %v1651_v25 = vrot.slane %v1650_v28, 4 }
 0x894   :  { %v1652_v26 = vadd.f32 %v1651_v25, %v1650_v28 }
 0x896   :  { %v1653_v63 = vrot.slane %v1652_v26, 2 }
 0x898   :  { %v1654_v0 = vadd.f32 %v1653_v63, %v1652_v26 }
 0x89a   :  { %v1655_v2 = vrot.slane %v1654_v0, 1 }
 0x89c   :  { %v1656_v3 = vadd.f32 %v1655_v2, %v1654_v0 }
 0x89e   :  { %2666 = vmatmul.mubr.f32.vlgmr.msra.gmra.mxu0 %v1656_v3 }
 0x89f   :  { %2709 = vmatpush3.msra.mxu0 %v3043_v47  ;;  %2710 = vmatprep.mubr.msk.f32.mxu0 %vm2784_vm2, %v2783_v1  ;;  %v2767_v47 = vld [vmem:[%s3489_s10 + $0x70] sm:$0xff] }
 0x8a0   :  { %2713 = vmatprep.subr.mxu0 %v2783_v1 }
 0x95e   :  { %v1723_v4 = vpop.f32.mrf.mxu0 }
 0x95f   :  { %v1727_v5 = vmul.f32 0.001953125, %v1723_v4 }
 0x960   :  { %v2667_v6 = vpop.f32.mrf.mxu0 }
 0x961   :  { %2671 = vmatmul.mubr.msk.f32.vlgmr.msra.gmra.mxu1 %vm434_vm3, %v1727_v5 }
 0x962   :  { %2674 = vmatpush3.msra.mxu1 %v2766_v7  ;;  %2705 = vmatprep.mubr.msk.f32.mxu1 %vm2784_vm2, %v2783_v1 }
 0x963   :  { %2675 = vmatprep.subr.mxu1 %v2783_v1 }
 0x964   :  { %2676 = vmatpush3.msra.mxu1 %v2767_v47 }
 0x965   :  { %2677 = vmatprep.subr.mxu1 %v2783_v1 }
 0x966   :  { %2678 = vmatpush3.msra.mxu1 %v2768_v8 }
 0x967   :  { %2679 = vmatprep.subr.mxu1 %v2783_v1 }
 0x968   :  { %2680 = vmatpush3.msra.mxu1 %v2769_v9 }
 0x969   :  { %2681 = vmatprep.subr.mxu1 %v2783_v1 }
 0x96a   :  { %2682 = vmatpush3.msra.mxu1 %v2770_v10 }
 0x96b   :  { %2683 = vmatprep.subr.mxu1 %v2783_v1 }
 0x96c   :  { %2684 = vmatpush3.msra.mxu1 %v2771_v11 }
 0x96d   :  { %2685 = vmatprep.subr.mxu1 %v2783_v1 }
 0x96e   :  { %2686 = vmatpush3.msra.mxu1 %v2772_v13 }
 0x96f   :  { %2687 = vmatprep.subr.mxu1 %v2783_v1 }
 0x970   :  { %2688 = vmatpush3.msra.mxu1 %v2773_v14 }
 0x971   :  { %2689 = vmatprep.subr.mxu1 %v2783_v1 }
 0x972   :  { %2690 = vmatpush3.msra.mxu1 %v2774_v16 }
 0x973   :  { %2691 = vmatprep.subr.mxu1 %v2783_v1 }
 0x974   :  { %2692 = vmatpush3.msra.mxu1 %v2775_v17 }
 0x975   :  { %2693 = vmatprep.subr.mxu1 %v2783_v1 }
 0x976   :  { %2694 = vmatpush3.msra.mxu1 %v2776_v18 }
 0x977   :  { %2695 = vmatprep.subr.mxu1 %v2783_v1 }
 0x978   :  { %2696 = vmatpush3.msra.mxu1 %v2777_v19 }
 0x979   :  { %2697 = vmatprep.subr.mxu1 %v2783_v1 }
 0x97a   :  { %2698 = vmatpush3.msra.mxu1 %v2778_v20 }
 0x97b   :  { %2699 = vmatprep.subr.mxu1 %v2783_v1 }
 0x97c   :  { %2700 = vmatpush3.msra.mxu1 %v2779_v22 }
 0x97d   :  { %2701 = vmatprep.subr.mxu1 %v2783_v1 }
 0x97e   :  { %2702 = vmatpush3.msra.mxu1 %v2780_v23 }
 0x97f   :  { %2703 = vmatprep.subr.mxu1 %v2783_v1 }
 0x980   :  { %2704 = vmatpush3.msra.mxu1 %v2781_v24 }
 0xa21   :  { %v1797_v29 = vpop.f32.mrf.mxu1 }
 0xa22   :  { %v1804_v30 = vrot.slane %v1797_v29, %v3085_v21 }
 0xa23   :  { %v2672_v48 = vpop.f32.mrf.mxu1 }
 0xa24   :  { %v1805_v49 = vsub.f32 %v3371_v44, %v1804_v30  ;;  %v1806_v50 = vsub.f32 %v3375_v46, %v1804_v30  ;;  %v1807_v51 = vsub.f32 %v3369_v43, %v1804_v30  ;;  %v1808_v52 = vsub.f32 %v3373_v45, %v1804_v30  ;;  %v2782_v44 = vld [vmem:[%s3490_s11] sm:$0xff] }
 0xa25   :  { %v1970_v45 = vld [vmem:[%s3498_s9] sm:$0x1] }
 0xa26   :  { %v1809_v53 = vmul.f32 %v1805_v49, %v1805_v49  ;;  %v1810_v54 = vmul.f32 %v1806_v50, %v1806_v50  ;;  %v1811_v55 = vmul.f32 %v1807_v51, %v1807_v51  ;;  %v1812_v57 = vmul.f32 %v1808_v52, %v1808_v52 }
 0xa28   :  { %v1813_v56 = vadd.f32 %v1810_v54, %v1809_v53 }
 0xa2a   :  { %v1814_v58 = vadd.f32 %v1813_v56, %v1811_v55 }
 0xa2c   :  { %v1815_v59 = vadd.f32 %v1814_v58, %v1812_v57 }
 0xa2e   :  { %v1816_v60 = vrot.slane %v1815_v59, 4 }
 0xa30   :  { %v1817_v61 = vadd.f32 %v1816_v60, %v1815_v59 }
 0xa32   :  { %v1818_v12 = vrot.slane %v1817_v61, 2 }
 0xa34   :  { %v1819_v15 = vadd.f32 %v1818_v12, %v1817_v61 }
 0xa36   :  { %v1820_v31 = vrot.slane %v1819_v15, 1 }
 0xa38   :  { %v1821_v32 = vadd.f32 %v1820_v31, %v1819_v15 }
 0xa3a   :  { %2706 = vmatmul.mubr.f32.vlgmr.msra.gmra.mxu1 %v1821_v32 }
 0xafa   :  { %v1888_v33 = vpop.f32.mrf.mxu1 }
 0xafb   :  { %v1892_v34 = vmul.f32 0.001953125, %v1888_v33 }
 0xafc   :  { %v2707_v35 = vpop.f32.mrf.mxu1 }
 0xafd   :  { %v1894_v36 = vadd.f32 1e-05, %v1892_v34 }
 0xaff   :  { %2764 = vrsqrt.f32 %v1894_v36 }
 0xb0c   :  { %v2765_v38 = vpop.eup %2764 }
 0xb0d   :  { %v1896_v43 = vmul.f32 %v2765_v38, %v1893_v37 }
 0xb0f   :  { %2711 = vmatmul.mubr.msk.f32.vlgmr.msra.gmra.mxu0 %vm434_vm3, %v1896_v43 }
 0xb10   :  { %2714 = vmatpush3.msra.mxu0 %v2782_v44  ;;  %2715 = vmatprep.mubr.msk.f32.mxu0 %vm2784_vm2, %v2783_v1 }
 0xb13   :  { %2716 = vmatmul.mubr.msk.f32.vlgmr.msra.gmra.mxu0 %vm434_vm3, %v1970_v45 }
 0xbcf   :  { %v1966_v46 = vpop.f32.mrf.mxu0 }
 0xbd0   :  { %v2047_v62 = vrot.slane %v1966_v46, %v3085_v21 }
 0xbd1   :  { %v2712_v27 = vpop.f32.mrf.mxu0 }
 0xbd2   :  { %v2048_v28 = vmul.f32 %v2047_v62, %v1805_v49  ;;  %v2049_v26 = vmul.f32 %v2047_v62, %v1806_v50  ;;  %v2050_v63 = vmul.f32 %v2047_v62, %v1807_v51  ;;  %v2051_v0 = vmul.f32 %v2047_v62, %v1808_v52 }
 0xbd3   :  { %v2040_v25 = vpop.f32.mrf.mxu0 }
 0xbd4   :  { %v2055_v2 = vrot.slane %v2040_v25, %v3085_v21 }
 0xbd5   :  { %v2717_v3 = vpop.f32.mrf.mxu0 }
 0xbd6   :  { %v2056_v4 = vadd.f32 %v2055_v2, %v2048_v28  ;;  %v2057_v1 = vadd.f32 %v2055_v2, %v2049_v26  ;;  %v2058_v5 = vadd.f32 %v2055_v2, %v2050_v63  ;;  %v2059_v6 = vadd.f32 %v2055_v2, %v2051_v0 }
 0xbd8   :  { %v2060_v7 = vadd.f32 %v2056_v4, %v3361_v39  ;;  %v2061_v47 = vadd.f32 %v2057_v1, %v3363_v40  ;;  %v2062_v8 = vadd.f32 %v2058_v5, %v3365_v41  ;;  %v2063_v9 = vadd.f32 %v2059_v6, %v3367_v42 }
 0xbda   :  { %v2064_v10 = vmax.f32 %v2060_v7, 0.0  ;;  %v2065_v11 = vmax.f32 %v2061_v47, 0.0  ;;  %v2066_v13 = vmax.f32 %v2062_v8, 0.0  ;;  %v2067_v14 = vmax.f32 %v2063_v9, 0.0 }
 0xbdc   :  { %2068 = vst [vmem:[%s3499_s12] sm:$0xff] %v2064_v10  ;;  %2069 = vst [vmem:[%s3499_s12 + $0x8] sm:$0xff] %v2065_v11 }
 0xbdd   :  { %2070 = vst [vmem:[%s3499_s12 + $0x10] sm:$0xff] %v2066_v13  ;;  %2071 = vst [vmem:[%s3499_s12 + $0x18] sm:$0xff] %v2067_v14 }

</bundles_post_ra>
